<compile_context>
chip_gen: v7x
topology: tpu7x:2x2x1
jax: 0.10.0
libtpu: 0.0.40
codegen_flags: <defaults>
</compile_context>

<pallas_src>
import jax
import jax.numpy as jnp
from jax.experimental import pallas as pl
from jax.experimental.pallas import tpu as pltpu


# ------------------------- Pallas kernel (hot path) -------------------------

def _basepartseg_kernel(x_ref, p_ref, clsb_ref,
                        w1x_ref, w1p_ref, b1_ref,
                        w2_ref, b2_ref,
                        wd_ref,
                        wh1_ref, bh1_ref,
                        wh2_ref, bh2_ref,
                        o_ref):
    # x_ref: (C_feat, tN) bf16 ; p_ref: (3, tN) bf16 ; clsb_ref: (H, 1) f32 (decoder bias + cls emb)
    # weights: (C_out, C_in) bf16 ; biases: (C_out, 1) f32 ; o_ref: (nc_pad, tN) bf16
    bf16 = jnp.bfloat16

    # encoder layer 1 — concat([x, pos^T]) folded into a split matmul (no HBM concat pass)
    h = (jnp.dot(w1x_ref[...], x_ref[...], preferred_element_type=jnp.float32)
         + jnp.dot(w1p_ref[...], p_ref[...], preferred_element_type=jnp.float32)
         + b1_ref[...])
    h = jnp.maximum(h, 0.0).astype(bf16)          # elementwise in f32, bf16 for the next MXU op

    # encoder layer 2
    h = jnp.dot(w2_ref[...], h, preferred_element_type=jnp.float32) + b2_ref[...]
    h = jnp.maximum(h, 0.0).astype(bf16)

    # decoder (pointwise conv; bias already includes the per-cloud class-label embedding)
    h = jnp.dot(wd_ref[...], h, preferred_element_type=jnp.float32) + clsb_ref[...]
    h = jnp.maximum(h, 0.0).astype(bf16)

    # head (SegHead): conv -> (folded BN) -> ReLU -> conv to (padded) num_classes
    h = jnp.dot(wh1_ref[...], h, preferred_element_type=jnp.float32) + bh1_ref[...]
    h = jnp.maximum(h, 0.0).astype(bf16)
    out = jnp.dot(wh2_ref[...], h, preferred_element_type=jnp.float32) + bh2_ref[...]

    o_ref[...] = out.astype(o_ref.dtype)


# ------------------------- wrapper -------------------------------------------

def basepartseg_forward(x, pos, cls_label, params, *, tile_n=2048):
    """x: (B, C_feat, N); pos: (B, N, 3); cls_label: (B,) int.
    Returns per-point part logits (B, num_classes, N) in bf16."""
    B, c_feat, N = x.shape
    assert pos.shape == (B, N, 3)

    tile_n = min(tile_n, N)
    if B == 1 and tile_n == N and N % 2 == 0 and (N // 2) % 128 == 0:
        tile_n = N // 2                      # keep >= 2 grid cells for v7x dual TensorCores
    assert N % tile_n == 0, "tile_n must divide N"
    assert tile_n % 128 == 0 or tile_n == N, "tile_n must be lane-aligned (or the full extent)"

    bf16 = jnp.bfloat16
    hidden = params['w2'].shape[0]
    num_classes = params['wh2'].shape[0]
    nc_pad = ((num_classes + 15) // 16) * 16     # sublane-dense (bf16 packs 16 rows / vreg)

    # streamed activations: bf16 HBM I/O; pos transposed once (tiny 3xN slab)
    xb = x.astype(bf16)                                   # (B, C_feat, N)
    pb = jnp.transpose(pos, (0, 2, 1)).astype(bf16)       # (B, 3, N)
    # decoder bias folded with per-cloud class-label embedding -> one conditioned bias per cloud
    cls_bias = (params['bd'][None, :, :]
                + params['cls_table'][cls_label][:, :, None]).astype(jnp.float32)   # (B, H, 1)

    # weights as bf16 MXU operands; biases stay f32 (v5e-safe elementwise)
    w1x = params['w1x'].astype(bf16)
    w1p = params['w1p'].astype(bf16)
    w2 = params['w2'].astype(bf16)
    wd = params['wd'].astype(bf16)
    wh1 = params['wh1'].astype(bf16)
    wh2_p = jnp.zeros((nc_pad, params['wh2'].shape[1]), jnp.float32
                      ).at[:num_classes].set(params['wh2']).astype(bf16)
    bh2_p = jnp.zeros((nc_pad, 1), jnp.float32).at[:num_classes].set(params['bh2'])
    b1, b2, bh1 = params['b1'], params['b2'], params['bh1']

    def wspec(a):
        # small resident parameter arrays: whole array as one block
        return pl.BlockSpec(a.shape, lambda b, n: (0,) * a.ndim)

    grid = (B, N // tile_n)

    out = pl.pallas_call(
        _basepartseg_kernel,
        out_shape=jax.ShapeDtypeStruct((B, nc_pad, N), bf16),
        grid_spec=pltpu.PrefetchScalarGridSpec(
            num_scalar_prefetch=0,
            grid=grid,
            in_specs=[
                pl.BlockSpec((None, c_feat, tile_n), lambda b, n: (b, 0, n)),
                pl.BlockSpec((None, 3, tile_n), lambda b, n: (b, 0, n)),
                pl.BlockSpec((None, hidden, 1), lambda b, n: (b, 0, 0)),
                wspec(w1x), wspec(w1p), wspec(b1),
                wspec(w2), wspec(b2),
                wspec(wd),
                wspec(wh1), wspec(bh1),
                wspec(wh2_p), wspec(bh2_p),
            ],
            out_specs=pl.BlockSpec((None, nc_pad, tile_n), lambda b, n: (b, 0, n)),
        ),
        compiler_params=pltpu.CompilerParams(
            dimension_semantics=("parallel", "parallel")),
        # VMEM footprint per step is < ~1 MB even at tile_n=4096, so the default scoped
        # limit is plenty; only set vmem_limit_bytes if tile_n is pushed toward very large N.
    )(xb, pb, cls_bias, w1x, w1p, b1, w2, b2, wd, wh1, bh1, wh2_p, bh2_p)

    return out[:, :num_classes, :]


# ------------------------- pure-JAX reference (same mixed precision) ---------

def basepartseg_reference(x, pos, cls_label, params):
    bf16, f32 = jnp.bfloat16, jnp.float32
    xb = x.astype(bf16)
    pb = jnp.transpose(pos, (0, 2, 1)).astype(bf16)
    cls_emb = params['cls_table'][cls_label].astype(f32)[:, :, None]

    def mm(w, h):
        return jnp.einsum('oc,bcn->bon', w.astype(bf16), h,
                          preferred_element_type=f32)

    h = mm(params['w1x'], xb) + mm(params['w1p'], pb) + params['b1'][None]
    h = jnp.maximum(h, 0.0).astype(bf16)
    h = mm(params['w2'], h) + params['b2'][None]
    h = jnp.maximum(h, 0.0).astype(bf16)
    h = mm(params['wd'], h) + params['bd'][None] + cls_emb
    h = jnp.maximum(h, 0.0).astype(bf16)
    h = mm(params['wh1'], h) + params['bh1'][None]
    h = jnp.maximum(h, 0.0).astype(bf16)
    out = mm(params['wh2'], h) + params['bh2'][None]
    return out.astype(bf16)


# ------------------------- setup & run ---------------------------------------

def make_params(key, c_feat, hidden=32, head_hidden=16, num_classes=13,
                num_shape_classes=16):
    shapes = {
        'w1x': (hidden, c_feat), 'w1p': (hidden, 3), 'b1': (hidden, 1),
        'w2': (hidden, hidden), 'b2': (hidden, 1),
        'wd': (hidden, hidden), 'bd': (hidden, 1),
        'wh1': (head_hidden, hidden), 'bh1': (head_hidden, 1),
        'wh2': (num_classes, head_hidden), 'bh2': (num_classes, 1),
        'cls_table': (num_shape_classes, hidden),
    }
    keys = jax.random.split(key, len(shapes))
    return {name: 0.1 * jax.random.normal(k, s, dtype=jnp.float32)
            for (name, s), k in zip(shapes.items(), keys)}


if __name__ == "__main__":
    key = jax.random.PRNGKey(0)
    kx, kp, kc, kw = jax.random.split(key, 4)

    B, C_feat, N = 2, 4, 2048
    num_classes, num_shape_classes = 13, 16

    # upstream activations assumed stored in bf16 (HBM traffic of the memory-bound kernel);
    # pos kept f32 — it is transposed + downcast once inside the wrapper.
    x = jax.random.normal(kx, (B, C_feat, N), dtype=jnp.float32).astype(jnp.bfloat16)
    pos = jax.random.uniform(kp, (B, N, 3), dtype=jnp.float32)
    cls0 = jax.random.randint(kc, (B,), 0, num_shape_classes)

    params = make_params(kw, c_feat=C_feat, num_classes=num_classes,
                         num_shape_classes=num_shape_classes)

    out = basepartseg_forward(x, pos, cls0, params, tile_n=1024)   # grid (2, 2)
    out = jax.block_until_ready(out)

    ref = basepartseg_reference(x, pos, cls0, params)
    assert out.shape == ref.shape == (B, num_classes, N)
    err = jnp.max(jnp.abs(out.astype(jnp.float32) - ref.astype(jnp.float32)))
    assert err < 3e-2, f"mismatch vs reference: max abs err {err}"

    print("KERNEL_OK")
</pallas_src>

<mosaic_0001>
module attributes {stable_mosaic.version = 11 : i64} {
  func.func @_basepartseg_kernel(%arg0: i32, %arg1: i32, %arg2: memref<1x4x1024xbf16, #tpu.memory_space<vmem>>, %arg3: memref<1x3x1024xbf16, #tpu.memory_space<vmem>>, %arg4: memref<1x32x1xf32, #tpu.memory_space<vmem>>, %arg5: memref<32x4xbf16, #tpu.memory_space<vmem>>, %arg6: memref<32x3xbf16, #tpu.memory_space<vmem>>, %arg7: memref<32x1xf32, #tpu.memory_space<vmem>>, %arg8: memref<32x32xbf16, #tpu.memory_space<vmem>>, %arg9: memref<32x1xf32, #tpu.memory_space<vmem>>, %arg10: memref<32x32xbf16, #tpu.memory_space<vmem>>, %arg11: memref<16x32xbf16, #tpu.memory_space<vmem>>, %arg12: memref<16x1xf32, #tpu.memory_space<vmem>>, %arg13: memref<16x16xbf16, #tpu.memory_space<vmem>>, %arg14: memref<16x1xf32, #tpu.memory_space<vmem>>, %arg15: memref<1x16x1024xbf16, #tpu.memory_space<vmem>>) attributes {dimension_semantics = [#tpu.dimension_semantics<parallel>, #tpu.dimension_semantics<parallel>], iteration_bounds = array<i64: 2, 2>, scalar_prefetch = 0 : i64, scratch_operands = 0 : i64, tpu.core_type = #tpu.core_type<tc>, window_params = [{transform_indices = @transform_0, window_bounds = array<i64: 1, 4, 1024>}, {transform_indices = @transform_1, window_bounds = array<i64: 1, 3, 1024>}, {transform_indices = @transform_2, window_bounds = array<i64: 1, 32, 1>}, {pipeline_mode = #tpu.pipeline_mode<synchronous>, transform_indices = @transform_3, window_bounds = array<i64: 32, 4>}, {pipeline_mode = #tpu.pipeline_mode<synchronous>, transform_indices = @transform_4, window_bounds = array<i64: 32, 3>}, {pipeline_mode = #tpu.pipeline_mode<synchronous>, transform_indices = @transform_5, window_bounds = array<i64: 32, 1>}, {pipeline_mode = #tpu.pipeline_mode<synchronous>, transform_indices = @transform_6, window_bounds = array<i64: 32, 32>}, {pipeline_mode = #tpu.pipeline_mode<synchronous>, transform_indices = @transform_7, window_bounds = array<i64: 32, 1>}, {pipeline_mode = #tpu.pipeline_mode<synchronous>, transform_indices = @transform_8, window_bounds = array<i64: 32, 32>}, {pipeline_mode = #tpu.pipeline_mode<synchronous>, transform_indices = @transform_9, window_bounds = array<i64: 16, 32>}, {pipeline_mode = #tpu.pipeline_mode<synchronous>, transform_indices = @transform_10, window_bounds = array<i64: 16, 1>}, {pipeline_mode = #tpu.pipeline_mode<synchronous>, transform_indices = @transform_11, window_bounds = array<i64: 16, 16>}, {pipeline_mode = #tpu.pipeline_mode<synchronous>, transform_indices = @transform_12, window_bounds = array<i64: 16, 1>}, {transform_indices = @transform_13, window_bounds = array<i64: 1, 16, 1024>}]} {
    %c0 = arith.constant 0 : index
    %c0_0 = arith.constant 0 : index
    %0 = vector.load %arg5[%c0, %c0_0] : memref<32x4xbf16, #tpu.memory_space<vmem>>, vector<32x4xbf16>
    %c0_1 = arith.constant 0 : index
    %c0_2 = arith.constant 0 : index
    %c0_3 = arith.constant 0 : index
    %1 = vector.load %arg2[%c0_1, %c0_2, %c0_3] : memref<1x4x1024xbf16, #tpu.memory_space<vmem>>, vector<1x4x1024xbf16>
    %2 = vector.shape_cast %1 : vector<1x4x1024xbf16> to vector<4x1024xbf16>
    %cst = arith.constant dense<0.000000e+00> : vector<32x1024xf32>
    %3 = tpu.matmul %0, %2, %cst {dimension_numbers = #tpu.dot_dimension_numbers<[1], [0], [0], [1], [0, 0, 1, 1], [], []>} : vector<32x4xbf16>, vector<4x1024xbf16>, vector<32x1024xf32> -> vector<32x1024xf32>
    %c0_4 = arith.constant 0 : index
    %c0_5 = arith.constant 0 : index
    %4 = vector.load %arg6[%c0_4, %c0_5] : memref<32x3xbf16, #tpu.memory_space<vmem>>, vector<32x3xbf16>
    %c0_6 = arith.constant 0 : index
    %c0_7 = arith.constant 0 : index
    %c0_8 = arith.constant 0 : index
    %5 = vector.load %arg3[%c0_6, %c0_7, %c0_8] : memref<1x3x1024xbf16, #tpu.memory_space<vmem>>, vector<1x3x1024xbf16>
    %6 = vector.shape_cast %5 : vector<1x3x1024xbf16> to vector<3x1024xbf16>
    %cst_9 = arith.constant dense<0.000000e+00> : vector<32x1024xf32>
    %7 = tpu.matmul %4, %6, %cst_9 {dimension_numbers = #tpu.dot_dimension_numbers<[1], [0], [0], [1], [0, 0, 1, 1], [], []>} : vector<32x3xbf16>, vector<3x1024xbf16>, vector<32x1024xf32> -> vector<32x1024xf32>
    %8 = arith.addf %3, %7 : vector<32x1024xf32>
    %c0_10 = arith.constant 0 : index
    %c0_11 = arith.constant 0 : index
    %9 = vector.load %arg7[%c0_10, %c0_11] : memref<32x1xf32, #tpu.memory_space<vmem>>, vector<32x1xf32>
    %10 = vector.broadcast %9 : vector<32x1xf32> to vector<32x1024xf32>
    %11 = arith.addf %8, %10 : vector<32x1024xf32>
    %cst_12 = arith.constant 0.000000e+00 : f32
    %12 = vector.broadcast %cst_12 : f32 to vector<32x1024xf32>
    %13 = arith.maximumf %11, %12 : vector<32x1024xf32>
    %14 = arith.truncf %13 : vector<32x1024xf32> to vector<32x1024xbf16>
    %c0_13 = arith.constant 0 : index
    %c0_14 = arith.constant 0 : index
    %15 = vector.load %arg8[%c0_13, %c0_14] : memref<32x32xbf16, #tpu.memory_space<vmem>>, vector<32x32xbf16>
    %cst_15 = arith.constant dense<0.000000e+00> : vector<32x1024xf32>
    %16 = tpu.matmul %15, %14, %cst_15 {dimension_numbers = #tpu.dot_dimension_numbers<[1], [0], [0], [1], [0, 0, 1, 1], [], []>} : vector<32x32xbf16>, vector<32x1024xbf16>, vector<32x1024xf32> -> vector<32x1024xf32>
    %c0_16 = arith.constant 0 : index
    %c0_17 = arith.constant 0 : index
    %17 = vector.load %arg9[%c0_16, %c0_17] : memref<32x1xf32, #tpu.memory_space<vmem>>, vector<32x1xf32>
    %18 = vector.broadcast %17 : vector<32x1xf32> to vector<32x1024xf32>
    %19 = arith.addf %16, %18 : vector<32x1024xf32>
    %cst_18 = arith.constant 0.000000e+00 : f32
    %20 = vector.broadcast %cst_18 : f32 to vector<32x1024xf32>
    %21 = arith.maximumf %19, %20 : vector<32x1024xf32>
    %22 = arith.truncf %21 : vector<32x1024xf32> to vector<32x1024xbf16>
    %c0_19 = arith.constant 0 : index
    %c0_20 = arith.constant 0 : index
    %23 = vector.load %arg10[%c0_19, %c0_20] : memref<32x32xbf16, #tpu.memory_space<vmem>>, vector<32x32xbf16>
    %cst_21 = arith.constant dense<0.000000e+00> : vector<32x1024xf32>
    %24 = tpu.matmul %23, %22, %cst_21 {dimension_numbers = #tpu.dot_dimension_numbers<[1], [0], [0], [1], [0, 0, 1, 1], [], []>} : vector<32x32xbf16>, vector<32x1024xbf16>, vector<32x1024xf32> -> vector<32x1024xf32>
    %c0_22 = arith.constant 0 : index
    %c0_23 = arith.constant 0 : index
    %c0_24 = arith.constant 0 : index
    %25 = vector.load %arg4[%c0_22, %c0_23, %c0_24] : memref<1x32x1xf32, #tpu.memory_space<vmem>>, vector<1x32x1xf32>
    %26 = vector.shape_cast %25 : vector<1x32x1xf32> to vector<32x1xf32>
    %27 = vector.broadcast %26 : vector<32x1xf32> to vector<32x1024xf32>
    %28 = arith.addf %24, %27 : vector<32x1024xf32>
    %cst_25 = arith.constant 0.000000e+00 : f32
    %29 = vector.broadcast %cst_25 : f32 to vector<32x1024xf32>
    %30 = arith.maximumf %28, %29 : vector<32x1024xf32>
    %31 = arith.truncf %30 : vector<32x1024xf32> to vector<32x1024xbf16>
    %c0_26 = arith.constant 0 : index
    %c0_27 = arith.constant 0 : index
    %32 = vector.load %arg11[%c0_26, %c0_27] : memref<16x32xbf16, #tpu.memory_space<vmem>>, vector<16x32xbf16>
    %cst_28 = arith.constant dense<0.000000e+00> : vector<16x1024xf32>
    %33 = tpu.matmul %32, %31, %cst_28 {dimension_numbers = #tpu.dot_dimension_numbers<[1], [0], [0], [1], [0, 0, 1, 1], [], []>} : vector<16x32xbf16>, vector<32x1024xbf16>, vector<16x1024xf32> -> vector<16x1024xf32>
    %c0_29 = arith.constant 0 : index
    %c0_30 = arith.constant 0 : index
    %34 = vector.load %arg12[%c0_29, %c0_30] : memref<16x1xf32, #tpu.memory_space<vmem>>, vector<16x1xf32>
    %35 = vector.broadcast %34 : vector<16x1xf32> to vector<16x1024xf32>
    %36 = arith.addf %33, %35 : vector<16x1024xf32>
    %cst_31 = arith.constant 0.000000e+00 : f32
    %37 = vector.broadcast %cst_31 : f32 to vector<16x1024xf32>
    %38 = arith.maximumf %36, %37 : vector<16x1024xf32>
    %39 = arith.truncf %38 : vector<16x1024xf32> to vector<16x1024xbf16>
    %c0_32 = arith.constant 0 : index
    %c0_33 = arith.constant 0 : index
    %40 = vector.load %arg13[%c0_32, %c0_33] : memref<16x16xbf16, #tpu.memory_space<vmem>>, vector<16x16xbf16>
    %cst_34 = arith.constant dense<0.000000e+00> : vector<16x1024xf32>
    %41 = tpu.matmul %40, %39, %cst_34 {dimension_numbers = #tpu.dot_dimension_numbers<[1], [0], [0], [1], [0, 0, 1, 1], [], []>} : vector<16x16xbf16>, vector<16x1024xbf16>, vector<16x1024xf32> -> vector<16x1024xf32>
    %c0_35 = arith.constant 0 : index
    %c0_36 = arith.constant 0 : index
    %42 = vector.load %arg14[%c0_35, %c0_36] : memref<16x1xf32, #tpu.memory_space<vmem>>, vector<16x1xf32>
    %43 = vector.broadcast %42 : vector<16x1xf32> to vector<16x1024xf32>
    %44 = arith.addf %41, %43 : vector<16x1024xf32>
    %45 = arith.truncf %44 : vector<16x1024xf32> to vector<16x1024xbf16>
    %c0_37 = arith.constant 0 : index
    %c0_38 = arith.constant 0 : index
    %c0_39 = arith.constant 0 : index
    %46 = vector.load %arg15[%c0_37, %c0_38, %c0_39] : memref<1x16x1024xbf16, #tpu.memory_space<vmem>>, vector<1x16x1024xbf16>
    %47 = vector.shape_cast %46 : vector<1x16x1024xbf16> to vector<16x1024xbf16>
    %48 = vector.shape_cast %45 : vector<16x1024xbf16> to vector<1x16x1024xbf16>
    tpu.vector_store %arg15[%c0_37, %c0_38, %c0_39], %48 {strides = array<i32>} : memref<1x16x1024xbf16, #tpu.memory_space<vmem>>, vector<1x16x1024xbf16>,
    return
  }
  func.func @transform_0(%arg0: i32, %arg1: i32) -> (i32, i32, i32) {
    %c0_i32 = arith.constant 0 : i32
    %c0_i32_0 = arith.constant 0 : i32
    return %arg0, %c0_i32, %arg1 : i32, i32, i32
  }
  func.func @transform_1(%arg0: i32, %arg1: i32) -> (i32, i32, i32) {
    %c0_i32 = arith.constant 0 : i32
    %c0_i32_0 = arith.constant 0 : i32
    return %arg0, %c0_i32, %arg1 : i32, i32, i32
  }
  func.func @transform_2(%arg0: i32, %arg1: i32) -> (i32, i32, i32) {
    %c0_i32 = arith.constant 0 : i32
    %c0_i32_0 = arith.constant 0 : i32
    %c0_i32_1 = arith.constant 0 : i32
    return %arg0, %c0_i32, %c0_i32_0 : i32, i32, i32
  }
  func.func @transform_3(%arg0: i32, %arg1: i32) -> (i32, i32) {
    %c0_i32 = arith.constant 0 : i32
    %c0_i32_0 = arith.constant 0 : i32
    %c0_i32_1 = arith.constant 0 : i32
    return %c0_i32, %c0_i32_0 : i32, i32
  }
  func.func @transform_4(%arg0: i32, %arg1: i32) -> (i32, i32) {
    %c0_i32 = arith.constant 0 : i32
    %c0_i32_0 = arith.constant 0 : i32
    %c0_i32_1 = arith.constant 0 : i32
    return %c0_i32, %c0_i32_0 : i32, i32
  }
  func.func @transform_5(%arg0: i32, %arg1: i32) -> (i32, i32) {
    %c0_i32 = arith.constant 0 : i32
    %c0_i32_0 = arith.constant 0 : i32
    %c0_i32_1 = arith.constant 0 : i32
    return %c0_i32, %c0_i32_0 : i32, i32
  }
  func.func @transform_6(%arg0: i32, %arg1: i32) -> (i32, i32) {
    %c0_i32 = arith.constant 0 : i32
    %c0_i32_0 = arith.constant 0 : i32
    %c0_i32_1 = arith.constant 0 : i32
    return %c0_i32, %c0_i32_0 : i32, i32
  }
  func.func @transform_7(%arg0: i32, %arg1: i32) -> (i32, i32) {
    %c0_i32 = arith.constant 0 : i32
    %c0_i32_0 = arith.constant 0 : i32
    %c0_i32_1 = arith.constant 0 : i32
    return %c0_i32, %c0_i32_0 : i32, i32
  }
  func.func @transform_8(%arg0: i32, %arg1: i32) -> (i32, i32) {
    %c0_i32 = arith.constant 0 : i32
    %c0_i32_0 = arith.constant 0 : i32
    %c0_i32_1 = arith.constant 0 : i32
    return %c0_i32, %c0_i32_0 : i32, i32
  }
  func.func @transform_9(%arg0: i32, %arg1: i32) -> (i32, i32) {
    %c0_i32 = arith.constant 0 : i32
    %c0_i32_0 = arith.constant 0 : i32
    %c0_i32_1 = arith.constant 0 : i32
    return %c0_i32, %c0_i32_0 : i32, i32
  }
  func.func @transform_10(%arg0: i32, %arg1: i32) -> (i32, i32) {
    %c0_i32 = arith.constant 0 : i32
    %c0_i32_0 = arith.constant 0 : i32
    %c0_i32_1 = arith.constant 0 : i32
    return %c0_i32, %c0_i32_0 : i32, i32
  }
  func.func @transform_11(%arg0: i32, %arg1: i32) -> (i32, i32) {
    %c0_i32 = arith.constant 0 : i32
    %c0_i32_0 = arith.constant 0 : i32
    %c0_i32_1 = arith.constant 0 : i32
    return %c0_i32, %c0_i32_0 : i32, i32
  }
  func.func @transform_12(%arg0: i32, %arg1: i32) -> (i32, i32) {
    %c0_i32 = arith.constant 0 : i32
    %c0_i32_0 = arith.constant 0 : i32
    %c0_i32_1 = arith.constant 0 : i32
    return %c0_i32, %c0_i32_0 : i32, i32
  }
  func.func @transform_13(%arg0: i32, %arg1: i32) -> (i32, i32, i32) {
    %c0_i32 = arith.constant 0 : i32
    %c0_i32_0 = arith.constant 0 : i32
    return %arg0, %c0_i32, %arg1 : i32, i32, i32
  }
}

</mosaic_0001>

<bundles_post_ra>
// kernel: tpu_custom_call.1
= control target key start
LH: loop header
LB: loop body
LE: loop exit
PB: predicated region body
PF: predicated region fallthrough
CT: control target
= control target key end

     0   :  { %18 = vsyncpa [#allocation3], 0  ;;  %s3297_s0 = inlined_call_operand.vmem [shape: bf16[2,4,2048], index: 0, kind: input, shape index: {}]   ;;  %s3298_s1 = inlined_call_operand.vmem [shape: bf16[2,3,2048], index: 1, kind: input, shape index: {}]   ;;  %s3299_s2 = inlined_call_operand.vmem [shape: f32[2,32,1], index: 2, kind: input, shape index: {}]   ;;  %s3300_s3 = inlined_call_operand.vmem [shape: bf16[32,4], index: 3, kind: input, shape index: {}]   ;;  %s3301_s4 = inlined_call_operand.vmem [shape: bf16[32,3], index: 4, kind: input, shape index: {}]   ;;  %s3302_s5 = inlined_call_operand.vmem [shape: f32[32,1], index: 5, kind: input, shape index: {}]   ;;  %s3303_s6 = inlined_call_operand.vmem [shape: bf16[32,32], index: 6, kind: input, shape index: {}]   ;;  %s3304_s7 = inlined_call_operand.vmem [shape: f32[32,1], index: 7, kind: input, shape index: {}]   ;;  %s3305_s8 = inlined_call_operand.vmem [shape: bf16[32,32], index: 8, kind: input, shape index: {}]   ;;  %s3306_s9 = inlined_call_operand.vmem [shape: bf16[16,32], index: 9, kind: input, shape index: {}]   ;;  %s3307_s10 = inlined_call_operand.vmem [shape: f32[16,1], index: 10, kind: input, shape index: {}]   ;;  %s3308_s11 = inlined_call_operand.vmem [shape: bf16[16,16], index: 11, kind: input, shape index: {}]   ;;  %s3309_s12 = inlined_call_operand.vmem [shape: f32[16,1], index: 12, kind: input, shape index: {}]   ;;  %s3310_s13 = inlined_call_operand.hbm [shape: bf16[2,16,2048], index: 13, kind: output, shape index: {}]  }
   0x1   :  { %20 = vsyncpa [#allocation3 + $0x1], 0  ;;  %s2820_s25 = smov 0   ;;  %s2822_s26 = smov 0  }
   0x2   :  { %s2824_s27 = smov 0   ;;  %s2826_s28 = smov 0  }
   0x3   :  { %s2828_s29 = smov 0   ;;  %s2830_s30 = smov 0  }
   0x4   :  { %s2832_s14 = smov 0   ;;  %s2834_s15 = smov 0  }
   0x5 LB: > { %3320 = sst [smem:[#allocation5_spill]] %s2713_s25  ;;  %s2431_s16 = sadd.s32 4294967295, %s2741_s15   ;;  %s2741_s15 = sphi %s2834_s15, %s26_s15   ;;  %s2737_s14 = sphi %s2832_s14, %s3339_s14   ;;  %s2733_s30 = sphi %s2830_s30, %s3338_s30   ;;  %s2729_s29 = sphi %s2828_s29, %s3337_s29   ;;  %s2725_s28 = sphi %s2826_s28, %s3336_s28   ;;  %s2721_s27 = sphi %s2824_s27, %s3342_s27   ;;  %s2717_s26 = sphi %s2822_s26, %s3341_s26   ;;  %s2713_s25 = sphi %s2820_s25, %s3340_s25  }
   0x6   : > { %3321 = sst [smem:[#allocation6_spill]] %s2721_s27  ;;  %s2432_s17 = sadd.s32 4294967294, %s2741_s15  }
   0x7   : > { %3322 = sst [smem:[#allocation7_spill]] %s2733_s30  ;;  %s35_s18 = sadd.s32 1, %s2733_s30 }
   0x8   : > { %3323 = sst [smem:[#allocation8_spill]] %s2737_s14  ;;  %p36_p0 = scmp.ge.s32.totalorder %s35_s18, 2 }
   0x9   : > { %3324 = sst [smem:[#allocation9_spill]] %s2741_s15  ;;  %s38_s19 = sadd.s32 1, %s2737_s14 }
   0xa   : > { %p349_p1 = scmp.ne.s32.totalorder %s2721_s27, %s2717_s26  ;;  %p350_p2 = scmp.eq.s32.totalorder %s2431_s16, 3 }
   0xb   : > { %s3344_s18 = smov (%p36_p0, %s35_s18), 0  ;;  %s3346_s19 = smov (!%p36_p0, %s38_s19), %s2737_s14 }
   0xc   : > { %3325 = sst [smem:[#allocation10_spill]] %s3344_s18  ;;  %s335_s20 = ssub.s32 %s2733_s30, %s3344_s18 }
   0xd   : > { %p2871_p3 = por %p350_p2, %p349_p1  ;;  %p40_p4 = scmp.ge.s32.totalorder %s3346_s19, 2 }
   0xe   : > { %p355_p5 = scmp.ne.s32.totalorder %s2717_s26, %s2713_s25  ;;  %p356_p6 = scmp.eq.s32.totalorder %s2432_s17, 3 }
   0xf   : > { %p2435_p7 = scmp.ge.s32.totalorder %s2741_s15, 1  ;;  %s3348_s19 = smov (%p40_p4, %s3346_s19), 0 }
  0x10   : > { %3327 = sst [smem:[#allocation11_spill]] %s3348_s19  ;;  %p2880_p8 = por %p356_p6, %p355_p5 }
  0x11   : > { %p438_p9 = scmp.lt.s32.totalorder %s2741_s15, 5  ;;  %s334_s23 = ssub.s32 %s2737_s14, %s3348_s19 }
  0x12   : > { %s3328_s22 = scalar_select %p2880_p8, 1, 0 }
  0x13   : > { %s339_s24 = sadd.s32 1, %s2721_s27  ;;  %s336_s16 = sor.u32 %s335_s20, %s334_s23 }
  0x14   : > { %3329 = sst [smem:[#allocation12_spill]] %s3328_s22  ;;  %p439_p10 = pnand %p2435_p7, %p438_p9 }
  0x15   : > { %p337_p11 = scmp.eq.s32.totalorder %s336_s16, 0  ;;  %s2892_s17 = sshll.u32 (!%p439_p10), %s2725_s28, 3  ;;  %v555_v0 = vlaneseq (!%p439_p10)  ;;  %v2743_v1 = vmov (!%p439_p10), 1983009808   ;;  %v2744_v4 = vmov (!%p439_p10), 0   ;;  %vm592_vm0 = vcmask (!%p439_p10), 1040384  }
  0x16   : > { %442 = sbr.rel (%p439_p10) target bundleno = 1256 (0x4e8), region = 72  ;;  %p501_p12 = scmp.lt.s32.totalorder (!%p439_p10), %s2729_s29, 1  ;;  %v553_v2 = vunpack.c.l.s4 (!%p439_p10), %v2743_v1  ;;  %652 = vmatprep.mubr.bf16.mxu0 (!%p439_p10), %v2744_v4  ;;  %705 = vmatprep.mubr.bf16.mxu1 (!%p439_p10), %v2744_v4  ;;  %vm593_vm1 = vcmask (!%p439_p10), 1041408   ;;  %v2745_v7 = vmov (!%p439_p10), 65535   ;;  %v1121_v9 = vld [vmem:[%s3302_s5] sm:$0xff] (!%p439_p10)  ;;  %v1123_v10 = vld [vmem:[%s3302_s5 + $0x10] sm:$0xff] (!%p439_p10) }
  0x17   : > { %s2889_s18 = scalar_select %p337_p11, %s2721_s27, %s339_s24  }
  0x18   : > { %p503_p13 = scmp.lt.s32.totalorder (!%p439_p10), %s2892_s17, 15  ;;  %v556_v3 = vshrl.u32 (!%p439_p10), %v555_v0, 7  ;;  %v554_v5 = vunpack.c.0.s8 (!%p439_p10), %v553_v2  ;;  %2631 = vset.pattern.permute.xlu0 (!%p439_p10), %v2744_v4  ;;  %2632 = vset.pattern.permute.xlu1 (!%p439_p10), %v2744_v4  ;;  %v594_v8 = vsel (!%p439_p10), %vm592_vm0, 4294967295, %v2745_v7  ;;  %v1122_v13 = vld [vmem:[%s3302_s5 + $0x8] sm:$0xff] (!%p439_p10)  ;;  %v1124_v18 = vld [vmem:[%s3302_s5 + $0x18] sm:$0xff] (!%p439_p10)  ;;  %v1229_v27 = vld [vmem:[%s3304_s7] sm:$0xff] (!%p439_p10) }
  0x19   : > { %3330 = sst [smem:[#allocation13_spill]] %s2889_s18  ;;  %1127 = vperm.xlu0 (!%p439_p10), %2631, %v1121_v9   ;;  %1137 = vperm.xlu1 (!%p439_p10), %2632, %v1123_v10   ;;  %v595_v16 = vsel (!%p439_p10), %vm593_vm1, %v594_v8, 0  ;;  %v1230_v31 = vld [vmem:[%s3304_s7 + $0x8] sm:$0xff] (!%p439_p10)  ;;  %v2637_v36 = vld [vmem:[%s3301_s4] sm:$0xff] (!%p439_p10)   ;;  %vm585_vm2 = vcmask (!%p439_p10), 23552   ;;  %v1231_v43 = vld [vmem:[%s3304_s7 + $0x10] sm:$0xff] (!%p439_p10) }
  0x1a   : > { %v2905_v6 = vsub.s32 (!%p439_p10), %v554_v5, %v556_v3  ;;  %v1232_v44 = vld [vmem:[%s3304_s7 + $0x18] sm:$0xff] (!%p439_p10)  ;;  %v2638_v45 = vld [vmem:[%s3301_s4 + $0x8] sm:$0xff] (!%p439_p10)   ;;  %v1836_v54 = vld [vmem:[%s3307_s10] sm:$0xff] (!%p439_p10)  ;;  %vm878_vm3 = vcmask (!%p439_p10), 31744   ;;  %vm1263_vm4 = vcmask (!%p439_p10), 261120   ;;  %vm2071_vm5 = vcmask (!%p439_p10), 130048  }
  0x1b   : > { %v2054_v59 = vld [vmem:[%s3309_s12] sm:$0xff] (!%p439_p10)  ;;  %v1837_v60 = vld [vmem:[%s3307_s10 + $0x8] sm:$0xff] (!%p439_p10)  ;;  %s497_s22 = sand.u32 (!%p439_p10), 1, %s2717_s26   ;;  %s2509_s16 = sshll.u32 (!%p439_p10), %s2729_s29, 5 }
  0x1c   : > { %v2055_v61 = vld [vmem:[%s3309_s12 + $0x8] sm:$0xff] (!%p439_p10)  ;;  %v2639_v62 = vld [vmem:[%s3300_s3] sm:$0xff] (!%p439_p10)   ;;  %s3245_s25 = scalar_lea.sflag (!%p439_p10), [#allocation3], %s497_s22 }
  0x1d   : > { %s2897_s19 = scalar_select %p501_p12, %s2729_s29, 1  ;;  %1132 = vperm.xlu0 %2631, %v1122_v13   ;;  %1142 = vperm.xlu1 %2632, %v1124_v18   ;;  %v2640_v1 = vld [vmem:[%s3300_s3 + $0x8] sm:$0xff]  }
  0x1e   : > { %s504_s20 = scalar_select %p503_p13, %s2892_s17, 15 }
  0x1f   : > { %s2438_s28 = sshll.u32 %s2897_s19, 4 }
  0x20   : > { %s506_s23 = sadd.s32 %s2438_s28, %s504_s20  ;;  %s2513_s28 = sshll.u32 %s2897_s19, 5 }
  0x21   : > { %s2439_s24 = sshll.u32 %s506_s23, 1  ;;  %1235 = vperm.xlu0 %2631, %v1229_v27   ;;  %1240 = vperm.xlu1 %2632, %v1230_v31   ;;  %s524_s19 = scalar_lea.vmem %s3299_s2, %s2513_s28 }
  0x22   : > { %s2913_s27 = scalar_lea.vmem %s3297_s0, %s2439_s24  ;;  %s518_s20 = scalar_lea.vmem %s3298_s1, %s2439_s24  ;;  %v1534_v47 = vld [vmem:[%s524_s19] sm:$0xff]  ;;  %v1535_v48 = vld [vmem:[%s524_s19 + $0x8] sm:$0xff]  ;;  %v1536_v50 = vld [vmem:[%s524_s19 + $0x10] sm:$0xff] }
  0x23   : > { %v531_v11 = vld [vmem:[%s2913_s27] sm:$0xff]  ;;  %v538_v14 = vld [vmem:[%s518_s20 + $0x8] sm:$0xff]  ;;  %v1537_v52 = vld [vmem:[%s524_s19 + $0x18] sm:$0xff]  ;;  %s2436_s24 = sshll.u32 %s497_s22, 6  ;;  %s2746_s19 = smov [#allocation2]  }
  0x24   : > { %v537_v12 = vld [vmem:[%s518_s20] sm:$0xff]  ;;  %v568_v19 = vcombine.high %v538_v14, %v538_v14  ;;  %v575_v20 = vrot.slane %v538_v14, %v2905_v6  ;;  %v844_v22 = vcombine.high %v531_v11, %v531_v11  ;;  %v851_v30 = vrot.slane %v531_v11, %v2905_v6  ;;  %v532_v46 = vld [vmem:[%s2913_s27 + $0x8] sm:$0xff]  ;;  %s3223_s27 = scalar_lea.vmem [#allocation2], %s2436_s24  ;;  %s2316_s20 = sadd.s32 %s2509_s16, %s2892_s17 }
  0x25   : > { %v558_v15 = vrot.slane %v537_v12, %v2905_v6  ;;  %v551_v17 = vcombine.high %v537_v12, %v537_v12  ;;  %1245 = vperm.xlu0 %2631, %v1231_v43   ;;  %1250 = vperm.xlu1 %2632, %v1232_v44   ;;  %v861_v49 = vcombine.high %v532_v46, %v532_v46  ;;  %s2510_s28 = sshll.u32 %s2316_s20, 6  ;;  %s2319_s23 = sshll.u32 %s3223_s27, 4  ;;  %s3238_s23 = int_to_ptr.vmem [resolvable:$true] %s2319_s23 }
  0x26   : > { %v583_v25 = vcombine.high %v575_v20, %v575_v20  ;;  %v582_v26 = vrot.slane %v568_v19, %v2905_v6  ;;  %v858_v37 = vrot.slane %v844_v22, %v2905_v6  ;;  %v609_v39 = vand.u32 %v595_v16, %v575_v20  ;;  %s3235_s14 = scalar_lea.hbm %s3310_s13, %s2510_s28  ;;  %s2647_s30 = scalar_lea.vmem %s3238_s23, 1024 }
  0x27   : > { %v566_v21 = vcombine.high %v558_v15, %v558_v15  ;;  %v565_v23 = vrot.slane %v551_v17, %v2905_v6  ;;  %v597_v24 = vand.u32 %v595_v16, %v558_v15  ;;  %v859_v40 = vcombine.high %v851_v30, %v851_v30  ;;  %p2648_p0 = scmp.ne.s32.totalorder %s3238_s23, %s2647_s30  ;;  %s2651_s15 = sshll.u32 %s2746_s19, 4  ;;  %s2652_s15 = int_to_ptr.vmem [resolvable:$false] %s2651_s15 }
  0x28   : > { %v612_v33 = vand.u32 %v595_v16, %v583_v25  ;;  %v584_v34 = vcombine.high %v582_v26, %v582_v26  ;;  %v615_v41 = vand.u32 %v595_v16, %v582_v26  ;;  %v860_v42 = vcombine.high %v858_v37, %v858_v37  ;;  %s2653_s18 = scalar_lea.vmem %s2652_s15, 2048  ;;  %p2654_p4 = scmp.lt.s32.totalorder %s3238_s23, %s2652_s15 }
  0x29   : > { %v600_v28 = vand.u32 %v595_v16, %v566_v21  ;;  %v567_v29 = vcombine.high %v565_v23, %v565_v23  ;;  %v603_v32 = vand.u32 %v595_v16, %v565_v23  ;;  %1540 = vperm.xlu0 %2631, %v1534_v47   ;;  %1545 = vperm.xlu1 %2632, %v1535_v48   ;;  %v886_v55 = vsel %vm593_vm1, %v851_v30, 0  ;;  %p2649_p1 = pnand %p2648_p0, %p2871_p3  ;;  %p2655_p5 = scmp.lt.s32.totalorder %s2653_s18, %s2647_s30 }
  0x2a   : > { %v618_v38 = vand.u32 %v595_v16, %v584_v34  ;;  %v868_v51 = vrot.slane %v532_v46, %v2905_v6  ;;  %v875_v53 = vrot.slane %v861_v49, %v2905_v6  ;;  %v892_v57 = vsel %vm593_vm1, %v858_v37, 0 }
  0x2b   : > { %620 = vmatprep.subr.bf16.mxu0 %v600_v28  ;;  %v606_v35 = vand.u32 %v595_v16, %v567_v29  ;;  %p2650_p2 = pneg %p2649_p1  ;;  %p2656_p6 = por %p2655_p5, %p2654_p4 }
  0x2c   : > { %621 = vmatpush1.bf16.msra.mxu0 %v597_v24  ;;  %v876_v56 = vcombine.high %v868_v51, %v868_v51  ;;  %v877_v58 = vcombine.high %v875_v53, %v875_v53  ;;  %v898_v63 = vsel %vm593_vm1, %v868_v51, 0  ;;  %v904_v0 = vsel %vm593_vm1, %v875_v53, 0 }
  0x2d   : > { %673 = vmatprep.subr.bf16.mxu1 %v606_v35  ;;  %726 = vmatprep.subr.bf16.mxu0 %v612_v33  ;;  %p2657_p7 = pnand %p2656_p6, %p2650_p2 }
  0x2e   : > { %674 = vmatpush1.bf16.msra.mxu1 %v603_v32  ;;  %1550 = vperm.xlu0 %2631, %v1536_v50  }
  0x2f   : > { %2447 = vmatmul.mubr.msk.bf16.vlgmr.msra.gmra.mrb[0].mxu0 %vm585_vm2, %v2637_v36  ;;  %779 = vmatprep.subr.bf16.mxu1 %v618_v38 }
  0x30   : > { %662 = vmatprep.mubr.bf16.mxu0 %v2744_v4  ;;  %727 = vmatpush1.bf16.msra.mxu0 %v609_v39 }
  0x31   : > { %2449 = vmatmul.mubr.msk.bf16.vlgmr.msra.gmra.mrb[0].mxu1 %vm585_vm2, %v2637_v36  ;;  %2457 = vmatprep.subr.msk.bf16.mxu0 %vm593_vm1, %v859_v40 }
  0x32   : > { %780 = vmatpush1.bf16.msra.mxu1 %v615_v41  ;;  %715 = vmatprep.mubr.bf16.mxu1 %v2744_v4 }
  0x33   : > { %2460 = vmatprep.subr.msk.bf16.mxu1 %vm593_vm1, %v860_v42  ;;  %1555 = vperm.xlu1 %2632, %v1537_v52  }
  0x34   : > { %1840 = vperm.xlu0 %2631, %v1836_v54  }
  0x37   : > { %2448 = vmatmul.mubr.msk.bf16.gmra.mrb[4].mxu0 %vm585_vm2, %v2638_v45  ;;  %1845 = vperm.xlu1 %2632, %v1837_v60  }
  0x38   : > { %758 = vmatprep.mubr.bf16.mxu0 %v2744_v4  ;;  %2058 = vperm.xlu0 %2631, %v2054_v59  }
  0x39   : > { %2450 = vmatmul.mubr.msk.bf16.gmra.mrb[4].mxu1 %vm585_vm2, %v2638_v45 }
  0x3a   : > { %811 = vmatprep.mubr.bf16.mxu1 %v2744_v4 }
  0x3b   : > { %2063 = vperm.xlu1 %2632, %v2055_v61  }
  0x3f   : > { %2451 = vmatmul.mubr.msk.bf16.vlgmr.msra.gmra.mrb[8].mxu0 %vm585_vm2, %v2637_v36 }
  0x40   : > { %768 = vmatprep.mubr.bf16.mxu0 %v2744_v4  ;;  %910 = vmatpush1.bf16.msra.mxu0 %v886_v55 }
  0x41   : > { %2453 = vmatmul.mubr.msk.bf16.vlgmr.msra.gmra.mrb[8].mxu1 %vm585_vm2, %v2637_v36  ;;  %2463 = vmatprep.subr.msk.bf16.mxu0 %vm593_vm1, %v876_v56 }
  0x42   : > { %963 = vmatpush1.bf16.msra.mxu1 %v892_v57  ;;  %821 = vmatprep.mubr.bf16.mxu1 %v2744_v4 }
  0x43   : > { %2466 = vmatprep.subr.msk.bf16.mxu1 %vm593_vm1, %v877_v58 }
  0x47   : > { %2452 = vmatmul.mubr.msk.bf16.gmra.mrb[12].mxu0 %vm585_vm2, %v2638_v45 }
  0x48   : > { %941 = vmatprep.mubr.bf16.mxu0 %v2744_v4 }
  0x49   : > { %2454 = vmatmul.mubr.msk.bf16.gmra.mrb[12].mxu1 %vm585_vm2, %v2638_v45 }
  0x4a   : > { %994 = vmatprep.mubr.bf16.mxu1 %v2744_v4 }
  0x4f   : > { %2458 = vmatmul.mubr.msk.bf16.vlgmr.msra.gmra.mrb[0].mxu0 %vm878_vm3, %v2639_v62 }
  0x50   : > { %951 = vmatprep.mubr.bf16.mxu0 %v2744_v4  ;;  %1016 = vmatpush1.bf16.msra.mxu0 %v898_v63 }
  0x51   : > { %2461 = vmatmul.mubr.msk.bf16.vlgmr.msra.gmra.mrb[0].mxu1 %vm878_vm3, %v2639_v62 }
  0x52   : > { %1069 = vmatpush1.bf16.msra.mxu1 %v904_v0  ;;  %1004 = vmatprep.mubr.bf16.mxu1 %v2744_v4 }
  0x57   : > { %2459 = vmatmul.mubr.msk.bf16.gmra.mrb[4].mxu0 %vm878_vm3, %v2640_v1 }
  0x58   : > { %1047 = vmatprep.mubr.bf16.mxu0 %v2744_v4 }
  0x59   : > { %2462 = vmatmul.mubr.msk.bf16.gmra.mrb[4].mxu1 %vm878_vm3, %v2640_v1 }
  0x5a   : > { %1100 = vmatprep.mubr.bf16.mxu1 %v2744_v4 }
  0x5f   : > { %2464 = vmatmul.mubr.msk.bf16.vlgmr.msra.gmra.mrb[8].mxu0 %vm878_vm3, %v2639_v62 }
  0x60   : > { %1057 = vmatprep.mubr.bf16.mxu0 %v2744_v4 }
  0x61   : > { %2467 = vmatmul.mubr.msk.bf16.vlgmr.msra.gmra.mrb[8].mxu1 %vm878_vm3, %v2639_v62 }
  0x62   : > { %1110 = vmatprep.mubr.bf16.mxu1 %v2744_v4 }
  0x67   : > { %2465 = vmatmul.mubr.msk.bf16.gmra.mrb[12].mxu0 %vm878_vm3, %v2640_v1 }
  0x68   : > { %1302 = vmatprep.mubr.bf16.mxu0 %v2744_v4 }
  0x69   : > { %2468 = vmatmul.mubr.msk.bf16.gmra.mrb[12].mxu1 %vm878_vm3, %v2640_v1 }
  0x6a   : > { %1355 = vmatprep.mubr.bf16.mxu1 %v2744_v4 }
  0x98   : > { %v3018_v2 = vpop.permute.xlu0 %1127  ;;  %v3020_v3 = vpop.permute.xlu1 %1137 }
  0x9c   : > { %v3022_v6 = vpop.permute.xlu0 %1132  ;;  %v3032_v33 = vpop.permute.xlu1 %1142 }
 0x122   : > { %v943_v5 = vpop.f32.mrb[0].mxu0 }
 0x123   : > { %v1145_v7 = vadd.f32 %v3018_v2, %v943_v5  ;;  %v945_v8 = vpop.f32.mrb[1].mxu0 }
 0x124   : > { %v1146_v9 = vadd.f32 %v3018_v2, %v945_v8  ;;  %v947_v10 = vpop.f32.mrb[2].mxu0  ;;  %v996_v11 = vpop.f32.mrb[0].mxu1 }
 0x125   : > { %v1153_v12 = vadd.f32 %v3022_v6, %v947_v10  ;;  %v1147_v13 = vadd.f32 %v3018_v2, %v996_v11  ;;  %v949_v14 = vpop.f32.mrb[3].mxu0  ;;  %v998_v15 = vpop.f32.mrb[1].mxu1  ;;  %v1177_v19 = vmax.f32 %v1145_v7, 0.0 }
 0x126   : > { %v1154_v16 = vadd.f32 %v3022_v6, %v949_v14  ;;  %v1148_v17 = vadd.f32 %v3018_v2, %v998_v15  ;;  %v1000_v18 = vpop.f32.mrb[2].mxu1  ;;  %v1178_v23 = vmax.f32 %v1146_v9, 0.0  ;;  %v3047_v9 = vld [vmem:[%s3303_s6] sm:$0xff]  }
 0x127   : > { %v1185_v20 = vmax.f32 %v1153_v12, 0.0  ;;  %v1155_v21 = vadd.f32 %v3022_v6, %v1000_v18  ;;  %v1002_v22 = vpop.f32.mrb[3].mxu1  ;;  %v1179_v27 = vmax.f32 %v1147_v13, 0.0 }
 0x128   : > { %v1186_v24 = vmax.f32 %v1154_v16, 0.0  ;;  %v1156_v25 = vadd.f32 %v3022_v6, %v1002_v22  ;;  %v1180_v30 = vmax.f32 %v1148_v17, 0.0 }
 0x129   : > { %v1209_v26 = vpack.c.bf16 %v1185_v20, %v1177_v19  ;;  %v1187_v28 = vmax.f32 %v1155_v21, 0.0 }
 0x12a   : > { %v1210_v29 = vpack.c.bf16 %v1186_v24, %v1178_v23  ;;  %v1188_v31 = vmax.f32 %v1156_v25, 0.0  ;;  %v953_v32 = vpop.f32.mrb[4].mxu0 }
 0x12b   : > { %v1211_v34 = vpack.c.bf16 %v1187_v28, %v1179_v27  ;;  %v1161_v35 = vadd.f32 %v3020_v3, %v953_v32  ;;  %v955_v36 = vpop.f32.mrb[5].mxu0 }
 0x12c   : > { %v1212_v37 = vpack.c.bf16 %v1188_v31, %v1180_v30  ;;  %v1162_v38 = vadd.f32 %v3020_v3, %v955_v36  ;;  %v957_v39 = vpop.f32.mrb[6].mxu0  ;;  %v1006_v40 = vpop.f32.mrb[4].mxu1  ;;  %1270 = vmatprep.subr.bf16.mxu0 %v1210_v29 }
 0x12d   : > { %v1169_v41 = vadd.f32 %v3032_v33, %v957_v39  ;;  %v1163_v42 = vadd.f32 %v3020_v3, %v1006_v40  ;;  %v959_v43 = vpop.f32.mrb[7].mxu0  ;;  %v1008_v44 = vpop.f32.mrb[5].mxu1  ;;  %1271 = vmatpush1.bf16.msra.mxu0 %v1209_v26  ;;  %v1193_v48 = vmax.f32 %v1161_v35, 0.0 }
 0x12e   : > { %v1170_v45 = vadd.f32 %v3032_v33, %v959_v43  ;;  %v1164_v46 = vadd.f32 %v3020_v3, %v1008_v44  ;;  %v1010_v47 = vpop.f32.mrb[6].mxu1  ;;  %1323 = vmatprep.subr.bf16.mxu1 %v1212_v37  ;;  %v1194_v52 = vmax.f32 %v1162_v38, 0.0  ;;  %v2642_v37 = vld [vmem:[%s3303_s6 + $0x8] sm:$0xff]  }
 0x12f   : > { %v1201_v49 = vmax.f32 %v1169_v41, 0.0  ;;  %v1171_v50 = vadd.f32 %v3032_v33, %v1010_v47  ;;  %v1012_v51 = vpop.f32.mrb[7].mxu1  ;;  %1324 = vmatpush1.bf16.msra.mxu1 %v1211_v34  ;;  %v1195_v56 = vmax.f32 %v1163_v42, 0.0 }
 0x130   : > { %v1202_v53 = vmax.f32 %v1170_v45, 0.0  ;;  %v1172_v54 = vadd.f32 %v3032_v33, %v1012_v51  ;;  %v1196_v59 = vmax.f32 %v1164_v46, 0.0 }
 0x131   : > { %v1217_v55 = vpack.c.bf16 %v1201_v49, %v1193_v48  ;;  %v1203_v57 = vmax.f32 %v1171_v50, 0.0 }
 0x132   : > { %v1218_v58 = vpack.c.bf16 %v1202_v53, %v1194_v52  ;;  %v1204_v60 = vmax.f32 %v1172_v54, 0.0  ;;  %v1049_v61 = vpop.f32.mrb[8].mxu0 }
 0x133   : > { %v1219_v62 = vpack.c.bf16 %v1203_v57, %v1195_v56  ;;  %v1149_v63 = vadd.f32 %v3018_v2, %v1049_v61  ;;  %v1051_v0 = vpop.f32.mrb[9].mxu0 }
 0x134   : > { %v1220_v1 = vpack.c.bf16 %v1204_v60, %v1196_v59  ;;  %v1150_v5 = vadd.f32 %v3018_v2, %v1051_v0  ;;  %v1053_v7 = vpop.f32.mrb[10].mxu0  ;;  %v1102_v8 = vpop.f32.mrb[8].mxu1  ;;  %1272 = vmatprep.subr.bf16.mxu0 %v1218_v58 }
 0x135   : > { %v1157_v10 = vadd.f32 %v3022_v6, %v1053_v7  ;;  %v1151_v11 = vadd.f32 %v3018_v2, %v1102_v8  ;;  %v1055_v12 = vpop.f32.mrb[11].mxu0  ;;  %v1104_v13 = vpop.f32.mrb[9].mxu1  ;;  %1273 = vmatpush1.bf16.msra.mxu0 %v1217_v55  ;;  %v1181_v17 = vmax.f32 %v1149_v63, 0.0 }
 0x136   : > { %v1158_v14 = vadd.f32 %v3022_v6, %v1055_v12  ;;  %v1152_v15 = vadd.f32 %v3018_v2, %v1104_v13  ;;  %v1106_v16 = vpop.f32.mrb[10].mxu1  ;;  %1325 = vmatprep.subr.bf16.mxu1 %v1220_v1  ;;  %v1182_v21 = vmax.f32 %v1150_v5, 0.0  ;;  %v3088_v60 = vpop.permute.xlu1 %1240 }
 0x137   : > { %v1189_v18 = vmax.f32 %v1157_v10, 0.0  ;;  %v1159_v19 = vadd.f32 %v3022_v6, %v1106_v16  ;;  %v1108_v20 = vpop.f32.mrb[11].mxu1  ;;  %1326 = vmatpush1.bf16.msra.mxu1 %v1219_v62  ;;  %v1183_v25 = vmax.f32 %v1151_v11, 0.0 }
 0x138   : > { %v1190_v22 = vmax.f32 %v1158_v14, 0.0  ;;  %v1160_v23 = vadd.f32 %v3022_v6, %v1108_v20  ;;  %2471 = vmatmul.mubr.msk.bf16.vlgmr.msra.gmra.mrb[16].mxu0 %vm1263_vm4, %v3047_v9  ;;  %v1184_v27 = vmax.f32 %v1152_v15, 0.0 }
 0x139   : > { %v1213_v24 = vpack.c.bf16 %v1189_v18, %v1181_v17  ;;  %v1191_v26 = vmax.f32 %v1159_v19, 0.0  ;;  %1312 = vmatprep.mubr.bf16.mxu0 %v2744_v4 }
 0x13a   : > { %v1214_v2 = vpack.c.bf16 %v1190_v22, %v1182_v21  ;;  %v1192_v28 = vmax.f32 %v1160_v23, 0.0  ;;  %v1059_v29 = vpop.f32.mrb[12].mxu0  ;;  %2473 = vmatmul.mubr.msk.bf16.vlgmr.msra.gmra.mrb[16].mxu1 %vm1263_vm4, %v3047_v9 }
 0x13b   : > { %v1215_v30 = vpack.c.bf16 %v1191_v26, %v1183_v25  ;;  %v1165_v31 = vadd.f32 %v3020_v3, %v1059_v29  ;;  %v1061_v32 = vpop.f32.mrb[13].mxu0  ;;  %1365 = vmatprep.mubr.bf16.mxu1 %v2744_v4 }
 0x13c   : > { %v1216_v6 = vpack.c.bf16 %v1192_v28, %v1184_v27  ;;  %v1166_v34 = vadd.f32 %v3020_v3, %v1061_v32  ;;  %v1063_v35 = vpop.f32.mrb[14].mxu0  ;;  %v1112_v36 = vpop.f32.mrb[12].mxu1  ;;  %1376 = vmatprep.subr.bf16.mxu0 %v1214_v2 }
 0x13d   : > { %v1173_v38 = vadd.f32 %v3032_v33, %v1063_v35  ;;  %v1167_v39 = vadd.f32 %v3020_v3, %v1112_v36  ;;  %v1065_v40 = vpop.f32.mrb[15].mxu0  ;;  %v1114_v41 = vpop.f32.mrb[13].mxu1  ;;  %1377 = vmatpush1.bf16.msra.mxu0 %v1213_v24  ;;  %v1197_v45 = vmax.f32 %v1165_v31, 0.0 }
 0x13e   : > { %v1174_v42 = vadd.f32 %v3032_v33, %v1065_v40  ;;  %v1168_v43 = vadd.f32 %v3020_v3, %v1114_v41  ;;  %v1116_v44 = vpop.f32.mrb[14].mxu1  ;;  %1429 = vmatprep.subr.bf16.mxu1 %v1216_v6  ;;  %v1198_v49 = vmax.f32 %v1166_v34, 0.0  ;;  %v3100_v27 = vpop.permute.xlu1 %1250 }
 0x13f   : > { %v1205_v46 = vmax.f32 %v1173_v38, 0.0  ;;  %v1175_v47 = vadd.f32 %v3032_v33, %v1116_v44  ;;  %v1118_v48 = vpop.f32.mrb[15].mxu1  ;;  %1430 = vmatpush1.bf16.msra.mxu1 %v1215_v30  ;;  %v1199_v53 = vmax.f32 %v1167_v39, 0.0 }
 0x140   : > { %v1206_v50 = vmax.f32 %v1174_v42, 0.0  ;;  %v1176_v51 = vadd.f32 %v3032_v33, %v1118_v48  ;;  %2472 = vmatmul.mubr.msk.bf16.gmra.mrb[20].mxu0 %vm1263_vm4, %v2642_v37  ;;  %v1200_v55 = vmax.f32 %v1168_v43, 0.0  ;;  %v3086_v33 = vpop.permute.xlu0 %1235 }
 0x141   : > { %v1221_v52 = vpack.c.bf16 %v1205_v46, %v1197_v45  ;;  %v1207_v54 = vmax.f32 %v1175_v47, 0.0  ;;  %1408 = vmatprep.mubr.bf16.mxu0 %v2744_v4 }
 0x142   : > { %v1222_v3 = vpack.c.bf16 %v1206_v50, %v1198_v49  ;;  %v1208_v56 = vmax.f32 %v1176_v51, 0.0  ;;  %2474 = vmatmul.mubr.msk.bf16.gmra.mrb[20].mxu1 %vm1263_vm4, %v2642_v37 }
 0x143   : > { %v1223_v57 = vpack.c.bf16 %v1207_v54, %v1199_v53  ;;  %1461 = vmatprep.mubr.bf16.mxu1 %v2744_v4 }
 0x144   : > { %v1224_v58 = vpack.c.bf16 %v1208_v56, %v1200_v55  ;;  %1378 = vmatprep.subr.bf16.mxu0 %v1222_v3  ;;  %v3098_v23 = vpop.permute.xlu0 %1245 }
 0x145   : > { %1379 = vmatpush1.bf16.msra.mxu0 %v1221_v52 }
 0x146   : > { %1431 = vmatprep.subr.bf16.mxu1 %v1224_v58 }
 0x147   : > { %1432 = vmatpush1.bf16.msra.mxu1 %v1223_v57 }
 0x148   : > { %2475 = vmatmul.mubr.msk.bf16.vlgmr.msra.gmra.mrb[24].mxu0 %vm1263_vm4, %v3047_v9 }
 0x149   : > { %1418 = vmatprep.mubr.bf16.mxu0 %v2744_v4 }
 0x14a   : > { %2477 = vmatmul.mubr.msk.bf16.vlgmr.msra.gmra.mrb[24].mxu1 %vm1263_vm4, %v3047_v9 }
 0x14b   : > { %1471 = vmatprep.mubr.bf16.mxu1 %v2744_v4 }
 0x150   : > { %2476 = vmatmul.mubr.msk.bf16.gmra.mrb[28].mxu0 %vm1263_vm4, %v2642_v37 }
 0x151   : > { %1606 = vmatprep.mubr.bf16.mxu0 %v2744_v4 }
 0x152   : > { %2478 = vmatmul.mubr.msk.bf16.gmra.mrb[28].mxu1 %vm1263_vm4, %v2642_v37 }
 0x153   : > { %1659 = vmatprep.mubr.bf16.mxu1 %v2744_v4 }
 0x20b   : > { %v1304_v59 = vpop.f32.mrb[16].mxu0 }
 0x20c   : > { %v1305_v61 = vadd.f32 %v1304_v59, %v3086_v33  ;;  %v1306_v62 = vpop.f32.mrb[17].mxu0 }
 0x20d   : > { %v1307_v63 = vadd.f32 %v1306_v62, %v3086_v33  ;;  %v1308_v0 = vpop.f32.mrb[18].mxu0  ;;  %v1357_v1 = vpop.f32.mrb[16].mxu1 }
 0x20e   : > { %v1309_v5 = vadd.f32 %v1308_v0, %v3088_v60  ;;  %v1358_v7 = vadd.f32 %v1357_v1, %v3086_v33  ;;  %v1310_v8 = vpop.f32.mrb[19].mxu0  ;;  %v1359_v9 = vpop.f32.mrb[17].mxu1  ;;  %v1482_v13 = vmax.f32 %v1305_v61, 0.0 }
 0x20f   : > { %v1311_v10 = vadd.f32 %v1310_v8, %v3088_v60  ;;  %v1360_v11 = vadd.f32 %v1359_v9, %v3086_v33  ;;  %v1361_v12 = vpop.f32.mrb[18].mxu1  ;;  %v1483_v17 = vmax.f32 %v1307_v63, 0.0  ;;  %v3115_v63 = vld [vmem:[%s3305_s8] sm:$0xff]  }
 0x210   : > { %v1490_v14 = vmax.f32 %v1309_v5, 0.0  ;;  %v1362_v15 = vadd.f32 %v1361_v12, %v3088_v60  ;;  %v1363_v16 = vpop.f32.mrb[19].mxu1  ;;  %v1484_v21 = vmax.f32 %v1358_v7, 0.0 }
 0x211   : > { %v1491_v18 = vmax.f32 %v1311_v10, 0.0  ;;  %v1364_v19 = vadd.f32 %v1363_v16, %v3088_v60  ;;  %v1485_v25 = vmax.f32 %v1360_v11, 0.0 }
 0x212   : > { %v1514_v20 = vpack.c.bf16 %v1490_v14, %v1482_v13  ;;  %v1492_v22 = vmax.f32 %v1362_v15, 0.0 }
 0x213   : > { %v1515_v24 = vpack.c.bf16 %v1491_v18, %v1483_v17  ;;  %v1493_v26 = vmax.f32 %v1364_v19, 0.0  ;;  %v1314_v2 = vpop.f32.mrb[20].mxu0 }
 0x214   : > { %v1516_v28 = vpack.c.bf16 %v1492_v22, %v1484_v21  ;;  %v1315_v29 = vadd.f32 %v1314_v2, %v3098_v23  ;;  %v1316_v30 = vpop.f32.mrb[21].mxu0 }
 0x215   : > { %v1517_v31 = vpack.c.bf16 %v1493_v26, %v1485_v25  ;;  %v1317_v32 = vadd.f32 %v1316_v30, %v3098_v23  ;;  %v1318_v6 = vpop.f32.mrb[22].mxu0  ;;  %v1367_v34 = vpop.f32.mrb[20].mxu1  ;;  %1574 = vmatprep.subr.bf16.mxu0 %v1515_v24 }
 0x216   : > { %v1319_v35 = vadd.f32 %v1318_v6, %v3100_v27  ;;  %v1368_v36 = vadd.f32 %v1367_v34, %v3098_v23  ;;  %v1320_v37 = vpop.f32.mrb[23].mxu0  ;;  %v1369_v38 = vpop.f32.mrb[21].mxu1  ;;  %1575 = vmatpush1.bf16.msra.mxu0 %v1514_v20  ;;  %v1498_v42 = vmax.f32 %v1315_v29, 0.0 }
 0x217   : > { %v1321_v39 = vadd.f32 %v1320_v37, %v3100_v27  ;;  %v1370_v40 = vadd.f32 %v1369_v38, %v3098_v23  ;;  %v1371_v41 = vpop.f32.mrb[22].mxu1  ;;  %1627 = vmatprep.subr.bf16.mxu1 %v1517_v31  ;;  %v1499_v46 = vmax.f32 %v1317_v32, 0.0  ;;  %v2644_v31 = vld [vmem:[%s3305_s8 + $0x8] sm:$0xff]  }
 0x218   : > { %v1506_v43 = vmax.f32 %v1319_v35, 0.0  ;;  %v1372_v44 = vadd.f32 %v1371_v41, %v3100_v27  ;;  %v1373_v45 = vpop.f32.mrb[23].mxu1  ;;  %1628 = vmatpush1.bf16.msra.mxu1 %v1516_v28  ;;  %v1500_v50 = vmax.f32 %v1368_v36, 0.0 }
 0x219   : > { %v1507_v47 = vmax.f32 %v1321_v39, 0.0  ;;  %v1374_v48 = vadd.f32 %v1373_v45, %v3100_v27  ;;  %v1501_v53 = vmax.f32 %v1370_v40, 0.0 }
 0x21a   : > { %v1522_v49 = vpack.c.bf16 %v1506_v43, %v1498_v42  ;;  %v1508_v51 = vmax.f32 %v1372_v44, 0.0 }
 0x21b   : > { %v1523_v52 = vpack.c.bf16 %v1507_v47, %v1499_v46  ;;  %v1509_v54 = vmax.f32 %v1374_v48, 0.0  ;;  %v1410_v3 = vpop.f32.mrb[24].mxu0 }
 0x21c   : > { %v1524_v55 = vpack.c.bf16 %v1508_v51, %v1500_v50  ;;  %v1411_v56 = vadd.f32 %v1410_v3, %v3086_v33  ;;  %v1412_v57 = vpop.f32.mrb[25].mxu0 }
 0x21d   : > { %v1525_v58 = vpack.c.bf16 %v1509_v54, %v1501_v53  ;;  %v1413_v59 = vadd.f32 %v1412_v57, %v3086_v33  ;;  %v1414_v61 = vpop.f32.mrb[26].mxu0  ;;  %v1463_v62 = vpop.f32.mrb[24].mxu1  ;;  %1576 = vmatprep.subr.bf16.mxu0 %v1523_v52 }
 0x21e   : > { %v1415_v0 = vadd.f32 %v1414_v61, %v3088_v60  ;;  %v1464_v1 = vadd.f32 %v1463_v62, %v3086_v33  ;;  %v1416_v5 = vpop.f32.mrb[27].mxu0  ;;  %v1465_v7 = vpop.f32.mrb[25].mxu1  ;;  %1577 = vmatpush1.bf16.msra.mxu0 %v1522_v49  ;;  %v1486_v11 = vmax.f32 %v1411_v56, 0.0 }
 0x21f   : > { %v1417_v8 = vadd.f32 %v1416_v5, %v3088_v60  ;;  %v1466_v9 = vadd.f32 %v1465_v7, %v3086_v33  ;;  %v1467_v10 = vpop.f32.mrb[26].mxu1  ;;  %1629 = vmatprep.subr.bf16.mxu1 %v1525_v58  ;;  %v1487_v15 = vmax.f32 %v1413_v59, 0.0  ;;  %v3156_v54 = vpop.permute.xlu1 %1545 }
 0x220   : > { %v1494_v12 = vmax.f32 %v1415_v0, 0.0  ;;  %v1468_v13 = vadd.f32 %v1467_v10, %v3088_v60  ;;  %v1469_v14 = vpop.f32.mrb[27].mxu1  ;;  %1630 = vmatpush1.bf16.msra.mxu1 %v1524_v55  ;;  %v1488_v19 = vmax.f32 %v1464_v1, 0.0 }
 0x221   : > { %v1495_v16 = vmax.f32 %v1417_v8, 0.0  ;;  %v1470_v17 = vadd.f32 %v1469_v14, %v3088_v60  ;;  %2481 = vmatmul.mubr.msk.bf16.vlgmr.msra.gmra.mrb[32].mxu0 %vm1263_vm4, %v3115_v63  ;;  %v1489_v21 = vmax.f32 %v1466_v9, 0.0 }
 0x222   : > { %v1518_v18 = vpack.c.bf16 %v1494_v12, %v1486_v11  ;;  %v1496_v20 = vmax.f32 %v1468_v13, 0.0  ;;  %1616 = vmatprep.mubr.bf16.mxu0 %v2744_v4 }
 0x223   : > { %v1519_v33 = vpack.c.bf16 %v1495_v16, %v1487_v15  ;;  %v1497_v22 = vmax.f32 %v1470_v17, 0.0  ;;  %v1420_v24 = vpop.f32.mrb[28].mxu0  ;;  %2483 = vmatmul.mubr.msk.bf16.vlgmr.msra.gmra.mrb[32].mxu1 %vm1263_vm4, %v3115_v63 }
 0x224   : > { %v1520_v25 = vpack.c.bf16 %v1496_v20, %v1488_v19  ;;  %v1421_v26 = vadd.f32 %v1420_v24, %v3098_v23  ;;  %v1422_v2 = vpop.f32.mrb[29].mxu0  ;;  %1669 = vmatprep.mubr.bf16.mxu1 %v2744_v4 }
 0x225   : > { %v1521_v60 = vpack.c.bf16 %v1497_v22, %v1489_v21  ;;  %v1423_v28 = vadd.f32 %v1422_v2, %v3098_v23  ;;  %v1424_v29 = vpop.f32.mrb[30].mxu0  ;;  %v1473_v30 = vpop.f32.mrb[28].mxu1  ;;  %1680 = vmatprep.subr.bf16.mxu0 %v1519_v33 }
 0x226   : > { %v1425_v32 = vadd.f32 %v1424_v29, %v3100_v27  ;;  %v1474_v6 = vadd.f32 %v1473_v30, %v3098_v23  ;;  %v1426_v34 = vpop.f32.mrb[31].mxu0  ;;  %v1475_v35 = vpop.f32.mrb[29].mxu1  ;;  %1681 = vmatpush1.bf16.msra.mxu0 %v1518_v18  ;;  %v1502_v39 = vmax.f32 %v1421_v26, 0.0 }
 0x227   : > { %v1427_v36 = vadd.f32 %v1426_v34, %v3100_v27  ;;  %v1476_v37 = vadd.f32 %v1475_v35, %v3098_v23  ;;  %v1477_v38 = vpop.f32.mrb[30].mxu1  ;;  %1733 = vmatprep.subr.bf16.mxu1 %v1521_v60  ;;  %v1503_v43 = vmax.f32 %v1423_v28, 0.0  ;;  %v3168_v21 = vpop.permute.xlu1 %1555 }
 0x228   : > { %v1510_v40 = vmax.f32 %v1425_v32, 0.0  ;;  %v1478_v41 = vadd.f32 %v1477_v38, %v3100_v27  ;;  %v1479_v42 = vpop.f32.mrb[31].mxu1  ;;  %1734 = vmatpush1.bf16.msra.mxu1 %v1520_v25  ;;  %v1504_v47 = vmax.f32 %v1474_v6, 0.0 }
 0x229   : > { %v1511_v44 = vmax.f32 %v1427_v36, 0.0  ;;  %v1480_v45 = vadd.f32 %v1479_v42, %v3100_v27  ;;  %2482 = vmatmul.mubr.msk.bf16.gmra.mrb[36].mxu0 %vm1263_vm4, %v2644_v31  ;;  %v1505_v49 = vmax.f32 %v1476_v37, 0.0  ;;  %v3154_v27 = vpop.permute.xlu0 %1540 }
 0x22a   : > { %v1526_v46 = vpack.c.bf16 %v1510_v40, %v1502_v39  ;;  %v1512_v48 = vmax.f32 %v1478_v41, 0.0  ;;  %1712 = vmatprep.mubr.bf16.mxu0 %v2744_v4 }
 0x22b   : > { %v1527_v23 = vpack.c.bf16 %v1511_v44, %v1503_v43  ;;  %v1513_v50 = vmax.f32 %v1480_v45, 0.0  ;;  %2484 = vmatmul.mubr.msk.bf16.gmra.mrb[36].mxu1 %vm1263_vm4, %v2644_v31 }
 0x22c   : > { %v1528_v51 = vpack.c.bf16 %v1512_v48, %v1504_v47  ;;  %1765 = vmatprep.mubr.bf16.mxu1 %v2744_v4 }
 0x22d   : > { %v1529_v52 = vpack.c.bf16 %v1513_v50, %v1505_v49  ;;  %1682 = vmatprep.subr.bf16.mxu0 %v1527_v23  ;;  %v3166_v17 = vpop.permute.xlu0 %1550 }
 0x22e   : > { %1683 = vmatpush1.bf16.msra.mxu0 %v1526_v46 }
 0x22f   : > { %1735 = vmatprep.subr.bf16.mxu1 %v1529_v52 }
 0x230   : > { %1736 = vmatpush1.bf16.msra.mxu1 %v1528_v51 }
 0x231   : > { %2485 = vmatmul.mubr.msk.bf16.vlgmr.msra.gmra.mrb[40].mxu0 %vm1263_vm4, %v3115_v63 }
 0x232   : > { %1722 = vmatprep.mubr.bf16.mxu0 %v2744_v4 }
 0x233   : > { %2487 = vmatmul.mubr.msk.bf16.vlgmr.msra.gmra.mrb[40].mxu1 %vm1263_vm4, %v3115_v63 }
 0x234   : > { %1775 = vmatprep.mubr.bf16.mxu1 %v2744_v4 }
 0x239   : > { %2486 = vmatmul.mubr.msk.bf16.gmra.mrb[44].mxu0 %vm1263_vm4, %v2644_v31 }
 0x23a   : > { %1888 = vmatprep.mubr.bf16.mxu0 %v2744_v4 }
 0x23b   : > { %2488 = vmatmul.mubr.msk.bf16.gmra.mrb[44].mxu1 %vm1263_vm4, %v2644_v31 }
 0x23c   : > { %1931 = vmatprep.mubr.bf16.mxu1 %v2744_v4 }
 0x2f4   : > { %v1608_v53 = vpop.f32.mrb[32].mxu0 }
 0x2f5   : > { %v1609_v3 = vadd.f32 %v1608_v53, %v3154_v27  ;;  %v1610_v55 = vpop.f32.mrb[33].mxu0 }
 0x2f6   : > { %v1611_v56 = vadd.f32 %v1610_v55, %v3154_v27  ;;  %v1612_v57 = vpop.f32.mrb[34].mxu0  ;;  %v1661_v58 = vpop.f32.mrb[32].mxu1 }
 0x2f7   : > { %v1613_v59 = vadd.f32 %v1612_v57, %v3156_v54  ;;  %v1662_v61 = vadd.f32 %v1661_v58, %v3154_v27  ;;  %v1614_v62 = vpop.f32.mrb[35].mxu0  ;;  %v1663_v63 = vpop.f32.mrb[33].mxu1  ;;  %v1786_v7 = vmax.f32 %v1609_v3, 0.0 }
 0x2f8   : > { %v1615_v0 = vadd.f32 %v1614_v62, %v3156_v54  ;;  %v1664_v1 = vadd.f32 %v1663_v63, %v3154_v27  ;;  %v1665_v5 = vpop.f32.mrb[34].mxu1  ;;  %v1787_v11 = vmax.f32 %v1611_v56, 0.0  ;;  %v3183_v56 = vld [vmem:[%s3306_s9] sm:$0xff]  }
 0x2f9   : > { %v1794_v8 = vmax.f32 %v1613_v59, 0.0  ;;  %v1666_v9 = vadd.f32 %v1665_v5, %v3156_v54  ;;  %v1667_v10 = vpop.f32.mrb[35].mxu1  ;;  %v1788_v15 = vmax.f32 %v1662_v61, 0.0 }
 0x2fa   : > { %v1795_v12 = vmax.f32 %v1615_v0, 0.0  ;;  %v1668_v13 = vadd.f32 %v1667_v10, %v3156_v54  ;;  %v1789_v19 = vmax.f32 %v1664_v1, 0.0 }
 0x2fb   : > { %v1818_v14 = vpack.c.bf16 %v1794_v8, %v1786_v7  ;;  %v1796_v16 = vmax.f32 %v1666_v9, 0.0 }
 0x2fc   : > { %v1819_v18 = vpack.c.bf16 %v1795_v12, %v1787_v11  ;;  %v1797_v20 = vmax.f32 %v1668_v13, 0.0  ;;  %v1618_v33 = vpop.f32.mrb[36].mxu0 }
 0x2fd   : > { %v1820_v22 = vpack.c.bf16 %v1796_v16, %v1788_v15  ;;  %v1619_v24 = vadd.f32 %v1618_v33, %v3166_v17  ;;  %v1620_v25 = vpop.f32.mrb[37].mxu0 }
 0x2fe   : > { %v1821_v26 = vpack.c.bf16 %v1797_v20, %v1789_v19  ;;  %v1621_v2 = vadd.f32 %v1620_v25, %v3166_v17  ;;  %v1622_v60 = vpop.f32.mrb[38].mxu0  ;;  %v1671_v28 = vpop.f32.mrb[36].mxu1  ;;  %1856 = vmatprep.subr.bf16.mxu0 %v1819_v18 }
 0x2ff   : > { %v1623_v29 = vadd.f32 %v1622_v60, %v3168_v21  ;;  %v1672_v30 = vadd.f32 %v1671_v28, %v3166_v17  ;;  %v1624_v31 = vpop.f32.mrb[39].mxu0  ;;  %v1673_v32 = vpop.f32.mrb[37].mxu1  ;;  %1857 = vmatpush1.bf16.msra.mxu0 %v1818_v14  ;;  %v1802_v36 = vmax.f32 %v1619_v24, 0.0 }
 0x300   : > { %v1625_v6 = vadd.f32 %v1624_v31, %v3168_v21  ;;  %v1674_v34 = vadd.f32 %v1673_v32, %v3166_v17  ;;  %v1675_v35 = vpop.f32.mrb[38].mxu1  ;;  %1899 = vmatprep.subr.bf16.mxu1 %v1821_v26  ;;  %v1803_v40 = vmax.f32 %v1621_v2, 0.0 }
 0x301   : > { %v1810_v37 = vmax.f32 %v1623_v29, 0.0  ;;  %v1676_v38 = vadd.f32 %v1675_v35, %v3168_v21  ;;  %v1677_v39 = vpop.f32.mrb[39].mxu1  ;;  %1900 = vmatpush1.bf16.msra.mxu1 %v1820_v22  ;;  %v1804_v44 = vmax.f32 %v1672_v30, 0.0 }
 0x302   : > { %v1811_v41 = vmax.f32 %v1625_v6, 0.0  ;;  %v1678_v42 = vadd.f32 %v1677_v39, %v3168_v21  ;;  %v1805_v47 = vmax.f32 %v1674_v34, 0.0 }
 0x303   : > { %v1826_v43 = vpack.c.bf16 %v1810_v37, %v1802_v36  ;;  %v1812_v45 = vmax.f32 %v1676_v38, 0.0 }
 0x304   : > { %v1827_v46 = vpack.c.bf16 %v1811_v41, %v1803_v40  ;;  %v1813_v48 = vmax.f32 %v1678_v42, 0.0  ;;  %v1714_v23 = vpop.f32.mrb[40].mxu0 }
 0x305   : > { %v1828_v49 = vpack.c.bf16 %v1812_v45, %v1804_v44  ;;  %v1715_v50 = vadd.f32 %v1714_v23, %v3154_v27  ;;  %v1716_v51 = vpop.f32.mrb[41].mxu0 }
 0x306   : > { %v1829_v52 = vpack.c.bf16 %v1813_v48, %v1805_v47  ;;  %v1717_v53 = vadd.f32 %v1716_v51, %v3154_v27  ;;  %v1718_v3 = vpop.f32.mrb[42].mxu0  ;;  %v1767_v55 = vpop.f32.mrb[40].mxu1  ;;  %1858 = vmatprep.subr.bf16.mxu0 %v1827_v46 }
 0x307   : > { %v1719_v57 = vadd.f32 %v1718_v3, %v3156_v54  ;;  %v1768_v58 = vadd.f32 %v1767_v55, %v3154_v27  ;;  %v1720_v59 = vpop.f32.mrb[43].mxu0  ;;  %v1769_v61 = vpop.f32.mrb[41].mxu1  ;;  %1859 = vmatpush1.bf16.msra.mxu0 %v1826_v43  ;;  %v1790_v1 = vmax.f32 %v1715_v50, 0.0 }
 0x308   : > { %v1721_v62 = vadd.f32 %v1720_v59, %v3156_v54  ;;  %v1770_v63 = vadd.f32 %v1769_v61, %v3154_v27  ;;  %v1771_v0 = vpop.f32.mrb[42].mxu1  ;;  %1901 = vmatprep.subr.bf16.mxu1 %v1829_v52  ;;  %v1791_v9 = vmax.f32 %v1717_v53, 0.0  ;;  %v1846_v47 = vpop.permute.xlu1 %1845 }
 0x309   : > { %v1798_v5 = vmax.f32 %v1719_v57, 0.0  ;;  %v1772_v7 = vadd.f32 %v1771_v0, %v3156_v54  ;;  %v1773_v8 = vpop.f32.mrb[43].mxu1  ;;  %1902 = vmatpush1.bf16.msra.mxu1 %v1828_v49  ;;  %v1792_v13 = vmax.f32 %v1768_v58, 0.0 }
 0x30a   : > { %v1799_v10 = vmax.f32 %v1721_v62, 0.0  ;;  %v1774_v11 = vadd.f32 %v1773_v8, %v3156_v54  ;;  %2490 = vmatmul.mubr.msk.bf16.vlgmr.msra.gmra.mrb[48].mxu0 %vm1263_vm4, %v3183_v56  ;;  %v1793_v15 = vmax.f32 %v1770_v63, 0.0 }
 0x30b   : > { %v1822_v12 = vpack.c.bf16 %v1798_v5, %v1790_v1  ;;  %v1800_v14 = vmax.f32 %v1772_v7, 0.0  ;;  %1974 = vmatprep.mubr.bf16.mxu0 %v2744_v4 }
 0x30c   : > { %v1823_v27 = vpack.c.bf16 %v1799_v10, %v1791_v9  ;;  %v1801_v16 = vmax.f32 %v1774_v11, 0.0  ;;  %v1724_v18 = vpop.f32.mrb[44].mxu0  ;;  %2491 = vmatmul.mubr.msk.bf16.vlgmr.msra.gmra.mrb[48].mxu1 %vm1263_vm4, %v3183_v56 }
 0x30d   : > { %v1824_v19 = vpack.c.bf16 %v1800_v14, %v1792_v13  ;;  %v1725_v20 = vadd.f32 %v1724_v18, %v3166_v17  ;;  %v1726_v33 = vpop.f32.mrb[45].mxu0  ;;  %2017 = vmatprep.mubr.bf16.mxu1 %v2744_v4 }
 0x30e   : > { %v1825_v54 = vpack.c.bf16 %v1801_v16, %v1793_v15  ;;  %v1727_v22 = vadd.f32 %v1726_v33, %v3166_v17  ;;  %v1728_v24 = vpop.f32.mrb[46].mxu0  ;;  %v1777_v25 = vpop.f32.mrb[44].mxu1  ;;  %1942 = vmatprep.subr.bf16.mxu0 %v1823_v27  ;;  %v2646_v27 = vld [vmem:[%s3308_s11] sm:$0xff]  }
 0x30f   : > { %v1729_v26 = vadd.f32 %v1728_v24, %v3168_v21  ;;  %v1778_v2 = vadd.f32 %v1777_v25, %v3166_v17  ;;  %v1730_v60 = vpop.f32.mrb[47].mxu0  ;;  %v1779_v28 = vpop.f32.mrb[45].mxu1  ;;  %1943 = vmatpush1.bf16.msra.mxu0 %v1822_v12  ;;  %v1806_v32 = vmax.f32 %v1725_v20, 0.0 }
 0x310   : > { %v1731_v29 = vadd.f32 %v1730_v60, %v3168_v21  ;;  %v1780_v30 = vadd.f32 %v1779_v28, %v3166_v17  ;;  %v1781_v31 = vpop.f32.mrb[46].mxu1  ;;  %1985 = vmatprep.subr.bf16.mxu1 %v1825_v54  ;;  %v1807_v36 = vmax.f32 %v1727_v22, 0.0 }
 0x311   : > { %v1814_v6 = vmax.f32 %v1729_v26, 0.0  ;;  %v1782_v34 = vadd.f32 %v1781_v31, %v3168_v21  ;;  %v1783_v35 = vpop.f32.mrb[47].mxu1  ;;  %1986 = vmatpush1.bf16.msra.mxu1 %v1824_v19  ;;  %v1808_v40 = vmax.f32 %v1778_v2, 0.0 }
 0x312   : > { %v1815_v37 = vmax.f32 %v1731_v29, 0.0  ;;  %v1784_v38 = vadd.f32 %v1783_v35, %v3168_v21  ;;  %v1809_v43 = vmax.f32 %v1780_v30, 0.0  ;;  %v1841_v21 = vpop.permute.xlu0 %1840 }
 0x313   : > { %v1830_v39 = vpack.c.bf16 %v1814_v6, %v1806_v32  ;;  %v1816_v41 = vmax.f32 %v1782_v34, 0.0 }
 0x314   : > { %v1831_v42 = vpack.c.bf16 %v1815_v37, %v1807_v36  ;;  %v1817_v44 = vmax.f32 %v1784_v38, 0.0 }
 0x315   : > { %v1832_v45 = vpack.c.bf16 %v1816_v41, %v1808_v40 }
 0x316   : > { %v1833_v17 = vpack.c.bf16 %v1817_v44, %v1809_v43  ;;  %1944 = vmatprep.subr.bf16.mxu0 %v1831_v42  ;;  %v2059_v42 = vpop.permute.xlu0 %2058  ;;  %v2064_v44 = vpop.permute.xlu1 %2063 }
 0x317   : > { %1945 = vmatpush1.bf16.msra.mxu0 %v1830_v39 }
 0x318   : > { %1987 = vmatprep.subr.bf16.mxu1 %v1833_v17 }
 0x319   : > { %1988 = vmatpush1.bf16.msra.mxu1 %v1832_v45 }
 0x31a   : > { %2492 = vmatmul.mubr.msk.bf16.vlgmr.msra.gmra.mrb[52].mxu0 %vm1263_vm4, %v3183_v56 }
 0x31b   : > { %2107 = vmatprep.mubr.bf16.mxu0 %v2744_v4 }
 0x31c   : > { %2493 = vmatmul.mubr.msk.bf16.vlgmr.msra.gmra.mrb[52].mxu1 %vm1263_vm4, %v3183_v56 }
 0x31d   : > { %2150 = vmatprep.mubr.bf16.mxu1 %v2744_v4 }
 0x3dd   : > { %v1890_v46 = vpop.f32.mrb[48].mxu0 }
 0x3de   : > { %v1891_v48 = vadd.f32 %v1890_v46, %v1841_v21  ;;  %v1892_v23 = vpop.f32.mrb[49].mxu0 }
 0x3df   : > { %v1893_v49 = vadd.f32 %v1892_v23, %v1841_v21  ;;  %v1894_v50 = vpop.f32.mrb[50].mxu0  ;;  %v1933_v51 = vpop.f32.mrb[48].mxu1 }
 0x3e0   : > { %v1895_v52 = vadd.f32 %v1894_v50, %v1846_v47  ;;  %v1934_v53 = vadd.f32 %v1933_v51, %v1841_v21  ;;  %v1896_v3 = vpop.f32.mrb[51].mxu0  ;;  %v1935_v55 = vpop.f32.mrb[49].mxu1  ;;  %v2028_v61 = vmax.f32 %v1891_v48, 0.0 }
 0x3e1   : > { %v1897_v57 = vadd.f32 %v1896_v3, %v1846_v47  ;;  %v1936_v58 = vadd.f32 %v1935_v55, %v1841_v21  ;;  %v1937_v59 = vpop.f32.mrb[50].mxu1  ;;  %v2029_v0 = vmax.f32 %v1893_v49, 0.0 }
 0x3e2   : > { %v2036_v62 = vmax.f32 %v1895_v52, 0.0  ;;  %v1938_v56 = vadd.f32 %v1937_v59, %v1846_v47  ;;  %v1939_v63 = vpop.f32.mrb[51].mxu1  ;;  %v2030_v8 = vmax.f32 %v1934_v53, 0.0 }
 0x3e3   : > { %v2037_v1 = vmax.f32 %v1897_v57, 0.0  ;;  %v1940_v5 = vadd.f32 %v1939_v63, %v1846_v47  ;;  %v2031_v11 = vmax.f32 %v1936_v58, 0.0 }
 0x3e4   : > { %v2044_v7 = vpack.c.bf16 %v2036_v62, %v2028_v61  ;;  %v2038_v9 = vmax.f32 %v1938_v56, 0.0 }
 0x3e5   : > { %v2045_v10 = vpack.c.bf16 %v2037_v1, %v2029_v0  ;;  %v2039_v12 = vmax.f32 %v1940_v5, 0.0 }
 0x3e6   : > { %v2046_v13 = vpack.c.bf16 %v2038_v9, %v2030_v8 }
 0x3e7   : > { %v2047_v14 = vpack.c.bf16 %v2039_v12, %v2031_v11  ;;  %2075 = vmatprep.subr.bf16.mxu0 %v2045_v10 }
 0x3e8   : > { %2076 = vmatpush1.bf16.msra.mxu0 %v2044_v7 }
 0x3e9   : > { %2118 = vmatprep.subr.bf16.mxu1 %v2047_v14 }
 0x3ea   : > { %2119 = vmatpush1.bf16.msra.mxu1 %v2046_v13 }
 0x3eb   : > { %2495 = vmatmul.mubr.msk.bf16.vlgmr.msra.gmra.mrb[56].mxu0 %vm2071_vm5, %v2646_v27 }
 0x3ec   : > { %2193 = vmatprep.mubr.bf16.mxu0 %v2744_v4 }
 0x3ed   : > { %v1976_v15 = vpop.f32.mrb[52].mxu0  ;;  %2496 = vmatmul.mubr.msk.bf16.vlgmr.msra.gmra.mrb[56].mxu1 %vm2071_vm5, %v2646_v27 }
 0x3ee   : > { %v1977_v16 = vadd.f32 %v1976_v15, %v1841_v21  ;;  %v1978_v18 = vpop.f32.mrb[53].mxu0  ;;  %2236 = vmatprep.mubr.bf16.mxu1 %v2744_v4 }
 0x3ef   : > { %v1979_v19 = vadd.f32 %v1978_v18, %v1841_v21  ;;  %v1980_v20 = vpop.f32.mrb[54].mxu0  ;;  %v2019_v33 = vpop.f32.mrb[52].mxu1 }
 0x3f0   : > { %v1981_v54 = vadd.f32 %v1980_v20, %v1846_v47  ;;  %v2020_v22 = vadd.f32 %v2019_v33, %v1841_v21  ;;  %v1982_v24 = vpop.f32.mrb[55].mxu0  ;;  %v2021_v25 = vpop.f32.mrb[53].mxu1  ;;  %v2032_v28 = vmax.f32 %v1977_v16, 0.0 }
 0x3f1   : > { %v1983_v26 = vadd.f32 %v1982_v24, %v1846_v47  ;;  %v2022_v2 = vadd.f32 %v2021_v25, %v1841_v21  ;;  %v2023_v60 = vpop.f32.mrb[54].mxu1  ;;  %v2033_v32 = vmax.f32 %v1979_v19, 0.0 }
 0x3f2   : > { %v2040_v29 = vmax.f32 %v1981_v54, 0.0  ;;  %v2024_v30 = vadd.f32 %v2023_v60, %v1846_v47  ;;  %v2025_v31 = vpop.f32.mrb[55].mxu1  ;;  %v2034_v4 = vmax.f32 %v2020_v22, 0.0 }
 0x3f3   : > { %v2041_v6 = vmax.f32 %v1983_v26, 0.0  ;;  %v2026_v34 = vadd.f32 %v2025_v31, %v1846_v47  ;;  %v2035_v38 = vmax.f32 %v2022_v2, 0.0 }
 0x3f4   : > { %v2048_v35 = vpack.c.bf16 %v2040_v29, %v2032_v28  ;;  %v2042_v36 = vmax.f32 %v2024_v30, 0.0 }
 0x3f5   : > { %v2049_v37 = vpack.c.bf16 %v2041_v6, %v2033_v32  ;;  %v2043_v39 = vmax.f32 %v2026_v34, 0.0 }
 0x3f6   : > { %v2050_v40 = vpack.c.bf16 %v2042_v36, %v2034_v4 }
 0x3f7   : > { %v2051_v41 = vpack.c.bf16 %v2043_v39, %v2035_v38  ;;  %2161 = vmatprep.subr.bf16.mxu0 %v2049_v37 }
 0x3f8   : > { %2162 = vmatpush1.bf16.msra.mxu0 %v2048_v35 }
 0x3f9   : > { %2204 = vmatprep.subr.bf16.mxu1 %v2051_v41 }
 0x3fa   : > { %2205 = vmatpush1.bf16.msra.mxu1 %v2050_v40 }
 0x3fb   : > { %2497 = vmatmul.mubr.msk.bf16.vlgmr.msra.gmra.mrb[60].mxu0 %vm2071_vm5, %v2646_v27 }
 0x3fd   : > { %2498 = vmatmul.mubr.msk.bf16.vlgmr.msra.gmra.mrb[60].mxu1 %vm2071_vm5, %v2646_v27 }
 0x4be   : > { %v2109_v43 = vpop.f32.mrb[56].mxu0 }
 0x4bf   : > { %v2110_v45 = vadd.f32 %v2109_v43, %v2059_v42  ;;  %v2111_v17 = vpop.f32.mrb[57].mxu0 }
 0x4c0   : > { %v2112_v21 = vadd.f32 %v2111_v17, %v2059_v42  ;;  %v2113_v46 = vpop.f32.mrb[58].mxu0  ;;  %v2152_v47 = vpop.f32.mrb[56].mxu1 }
 0x4c1   : > { %v2114_v48 = vadd.f32 %v2113_v46, %v2064_v44  ;;  %v2153_v23 = vadd.f32 %v2152_v47, %v2059_v42  ;;  %v2115_v49 = vpop.f32.mrb[59].mxu0  ;;  %v2154_v50 = vpop.f32.mrb[57].mxu1 }
 0x4c2   : > { %v2514_v51 = vpack.c.bf16 %v2112_v21, %v2110_v45  ;;  %v2116_v52 = vadd.f32 %v2115_v49, %v2064_v44  ;;  %v2155_v53 = vadd.f32 %v2154_v50, %v2059_v42  ;;  %v2156_v3 = vpop.f32.mrb[58].mxu1 }
 0x4c3   : > { %v2157_v55 = vadd.f32 %v2156_v3, %v2064_v44  ;;  %v2158_v57 = vpop.f32.mrb[59].mxu1 }
 0x4c4   : > { %2295 = vst [vmem:[%s3223_s27] sm:$0xff] %v2514_v51  ;;  %v2518_v58 = vpack.c.bf16 %v2116_v52, %v2114_v48  ;;  %v2515_v59 = vpack.c.bf16 %v2155_v53, %v2153_v23  ;;  %v2159_v61 = vadd.f32 %v2158_v57, %v2064_v44 }
 0x4c6   : > { %2299 = vst [vmem:[%s3223_s27 + $0x20] sm:$0xff] %v2518_v58  ;;  %2296 = vst [vmem:[%s3223_s27 + $0x8] sm:$0xff] %v2515_v59  ;;  %v2519_v62 = vpack.c.bf16 %v2159_v61, %v2157_v55 }
 0x4c8   : > { %2300 = vst [vmem:[%s3223_s27 + $0x28] sm:$0xff] %v2519_v62 }
 0x4ce   : > { %v2195_v56 = vpop.f32.mrb[60].mxu0 }
 0x4cf   : > { %v2196_v63 = vadd.f32 %v2195_v56, %v2059_v42  ;;  %v2197_v0 = vpop.f32.mrb[61].mxu0 }
 0x4d0   : > { %v2198_v1 = vadd.f32 %v2197_v0, %v2059_v42  ;;  %v2199_v5 = vpop.f32.mrb[62].mxu0  ;;  %v2238_v7 = vpop.f32.mrb[60].mxu1 }
 0x4d1   : > { %v2200_v8 = vadd.f32 %v2199_v5, %v2064_v44  ;;  %v2239_v9 = vadd.f32 %v2238_v7, %v2059_v42  ;;  %v2201_v10 = vpop.f32.mrb[63].mxu0  ;;  %v2240_v11 = vpop.f32.mrb[61].mxu1 }
 0x4d2   : > { %v2516_v12 = vpack.c.bf16 %v2198_v1, %v2196_v63  ;;  %v2202_v13 = vadd.f32 %v2201_v10, %v2064_v44  ;;  %v2241_v14 = vadd.f32 %v2240_v11, %v2059_v42  ;;  %v2242_v27 = vpop.f32.mrb[62].mxu1 }
 0x4d3   : > { %v2243_v15 = vadd.f32 %v2242_v27, %v2064_v44  ;;  %v2244_v16 = vpop.f32.mrb[63].mxu1 }
 0x4d4   : > { %2297 = vst [vmem:[%s3223_s27 + $0x10] sm:$0xff] %v2516_v12  ;;  %v2520_v18 = vpack.c.bf16 %v2202_v13, %v2200_v8  ;;  %v2517_v19 = vpack.c.bf16 %v2241_v14, %v2239_v9  ;;  %v2245_v20 = vadd.f32 %v2244_v16, %v2064_v44 }
 0x4d6   : > { %2301 = vst [vmem:[%s3223_s27 + $0x30] sm:$0xff] %v2520_v18  ;;  %2298 = vst [vmem:[%s3223_s27 + $0x18] sm:$0xff] %v2517_v19  ;;  %v2521_v33 = vpack.c.bf16 %v2245_v20, %v2243_v15 }
 0x4d8   : > { %2302 = vst [vmem:[%s3223_s27 + $0x38] sm:$0xff] %v2521_v33 }
 0x4d9   : > { %2660 = shalt.err (!%p2657_p7)
}
 0x4da   : > { %s2661_s22 = scalar_lea.hbm %s3235_s14, 1024  ;;  %s2665_s16 = scalar_lea.hbm %s3310_s13, 4096 }
 0x4db   : > { %p2662_p9 = scmp.ne.s32.totalorder %s3235_s14, %s2661_s22  ;;  %p2666_p12 = scmp.lt.u32.totalorder %s3235_s14, %s3310_s13 }
 0x4dc   : > { %p2667_p13 = scmp.lt.u32.totalorder %s2665_s16, %s2661_s22  ;;  %p2669_p1 = scmp.lt.u32.totalorder %s2661_s22, %s3235_s14 }
 0x4dd   : > { %p2663_p10 = pnand %p2662_p9, %p2871_p3 }
 0x4de   : > { %p2668_p0 = por %p2667_p13, %p2666_p12 }
 0x4df   : > { %p2664_p11 = pneg %p2663_p10 }
 0x4e0   : > { %p2670_p2 = por %p2669_p1, %p2668_p0 }
 0x4e2   : > { %p2671_p4 = pnand %p2670_p2, %p2664_p11 }
 0x4e4   : > { %2674 = shalt.err (!%p2671_p4)
}
 0x4e5   : > { %s2747_s29 = smov 512   ;;  %s2748_s17 = smov 1024  }
 0x4e6   : > { %s2749_s30 = smov 32  }
 0x4e7   : > { %2554 = dma.vmem_to_hbm [thread:$0]  (%p2871_p3), %s3238_s23, 1024, %s3235_s14, %s3245_s25, %s2747_s29, %s2748_s17, %s2749_s30  }
 0x4e8 PF: > { %s3331_s19 = sld [smem:[#allocation9_spill]]  ;;  %s3332_s15 = sld [smem:[#allocation5_spill]] }
 0x4ee   : > { %p2560_p5 = scmp.ge.s32.totalorder %s3331_s19, 2  ;;  %s2334_s24 = sand.u32 1, %s3332_s15  }
 0x4ef   : > { %s2335_s22 = scalar_lea.sflag [#allocation3], %s2334_s24 }
 0x4f0   : > { %p2557_p6 = pnand %p2560_p5, %p2880_p8 }
 0x4f2   : > { %2708 = dma.done.wait (!%p2557_p6), %s2335_s22, 1024  }
 0x4f3   : > { %2710 = vsyncadd (!%p2557_p6), %s2335_s22, 4294966272  ;;  %s26_s15 = sadd.s32 1, %s3331_s19   ;;  %s3334_s27 = sld [smem:[#allocation6_spill]] }
 0x4f4   : > { %p23_p7 = scmp.ge.s32.totalorder %s26_s15, 6   ;;  %s3335_s16 = sld [smem:[#allocation13_spill]] }
 0x4f5   : > { %s3336_s28 = sld [smem:[#allocation7_spill]]  ;;  %s3337_s29 = sld [smem:[#allocation8_spill]] }
 0x4f6   : > { %s3338_s30 = sld [smem:[#allocation10_spill]]  ;;  %s3339_s14 = sld [smem:[#allocation11_spill]] }
 0x4f7   : > { %s3340_s25 = smov %s2717_s26  ;;  %25 = sbr.rel (!%p23_p7) target bundleno = 5 (0x5), region = 113 }
 0x4f9   : > { %s3341_s26 = smov %s3334_s27 }
 0x4fa   : > { %s3342_s27 = smov %s3335_s16 }
 0x4fe   :  { %2340 = vsyncpa [#allocation3], 1 }
 0x4ff   :  { %2342 = vsyncpa [#allocation3 + $0x1], 1 }

</bundles_post_ra>
